<compile_context>
chip_gen: v7x
topology: tpu7x:2x2x1
jax: 0.10.0
libtpu: 0.0.40
codegen_flags: <defaults>
</compile_context>

<pallas_src>
import numpy as np
import jax
import jax.numpy as jnp
from jax.experimental import pallas as pl
from jax.experimental.pallas import tpu as pltpu


def _shifted_dft_matrix(n: int, inverse: bool) -> np.ndarray:
    """Orthonormal (i)DFT matrix with ifftshift(input)/fftshift(output) folded in.

    result[k, m] = F[(k - n//2) % n, (m + (n+1)//2) % n]
    """
    idx = np.arange(n)
    sign = 1.0 if inverse else -1.0
    F = np.exp(sign * 2j * np.pi * np.outer(idx, idx) / n) / np.sqrt(n)
    return np.roll(np.roll(F, n // 2, axis=0), -((n + 1) // 2), axis=1)


def _mat_triplet(mat: np.ndarray):
    """Pre-transposed (for right-multiplication) real / imag / real+imag parts."""
    mr = np.ascontiguousarray(mat.T.real).astype(np.float32)
    mi = np.ascontiguousarray(mat.T.imag).astype(np.float32)
    return (jnp.asarray(mr), jnp.asarray(mi), jnp.asarray(mr + mi))


def _make_dc_kernel(precision):
    """Build the kernel body; `precision` is closed over for the MXU dots."""

    def kernel(awt_r, awt_i, awt_s, aht_r, aht_i, aht_s,
               bht_r, bht_i, bht_s, bwt_r, bwt_i, bwt_s,
               m_ref, xr_ref, xa_ref, out_ref):
        TB, _, H, W = xr_ref.shape

        def dot(a, b):
            return jnp.dot(a, b, preferred_element_type=jnp.float32,
                           precision=precision)

        def cmul3(xr, xi, mr_ref, mi_ref, ms_ref):
            # (xr + i*xi) @ (mr + i*mi) with 3 real matmuls (Karatsuba); the
            # matrix sum (mr + mi) is a precomputed resident constant.
            p1 = dot(xr, mr_ref[...])
            p2 = dot(xi, mi_ref[...])
            p3 = dot(xr + xi, ms_ref[...])
            return p1 - p2, p3 - p1 - p2

        def t_wh(a):  # (N, H, W) -> (N, W, H) lane-layout-aware relayout
            return pltpu.einshape("nhw->nwh", a)

        def fwd(img_ref):
            # Shifted forward DFT of one (TB, 2, H, W) complex image block,
            # result kept in transposed (TB, W, H) layout: (A_H @ X @ A_W^T)^T
            xr = img_ref[:, 0, :, :].reshape(TB * H, W)
            xi = img_ref[:, 1, :, :].reshape(TB * H, W)
            s_r, s_i = cmul3(xr, xi, awt_r, awt_i, awt_s)      # X @ A_W^T
            s_r = t_wh(s_r.reshape(TB, H, W)).reshape(TB * W, H)
            s_i = t_wh(s_i.reshape(TB, H, W)).reshape(TB * W, H)
            f_r, f_i = cmul3(s_r, s_i, aht_r, aht_i, aht_s)    # (..)^T @ A_H^T
            return f_r.reshape(TB, W, H), f_i.reshape(TB, W, H)

        # Forward DFTs of x_rec and x_alised (kept separate: TB*H rows per dot
        # already fill the MXU; avoids the old stacking copies).
        tr_r, tr_i = fwd(xr_ref)
        tu_r, tu_i = fwd(xa_ref)

        # Masked k-space combine in the transposed layout (only the mask
        # channels are relaid out).
        m0t = t_wh(m_ref[:, 0, :, :])
        m1t = t_wh(m_ref[:, 1, :, :])
        k_r = (1.0 - m0t) * tr_r + tu_r
        k_i = (1.0 - m1t) * tr_i + tu_i

        # Inverse: O = B_H @ K @ B_W^T, starting from K^T.
        g_r, g_i = cmul3(k_r.reshape(TB * W, H), k_i.reshape(TB * W, H),
                         bht_r, bht_i, bht_s)                  # (B_H @ K)^T
        g_r = t_wh(g_r.reshape(TB, W, H)).reshape(TB * H, W)
        g_i = t_wh(g_i.reshape(TB, W, H)).reshape(TB * H, W)
        o_r, o_i = cmul3(g_r, g_i, bwt_r, bwt_i, bwt_s)        # O

        # Direct per-channel slice stores (no (TB,2,H,W) concatenate copy);
        # stores are W-lane-dense for production MRI sizes (W >= 128).
        out_ref[:, 0, :, :] = o_r.reshape(TB, H, W)
        out_ref[:, 1, :, :] = o_i.reshape(TB, H, W)

    return kernel


def _vmem_capacity_bytes() -> int:
    try:
        return int(getattr(pltpu.get_tpu_info(), "vmem_capacity_bytes"))
    except Exception:
        return 64 << 20   # conservative fallback: v7x per-TensorCore VMEM


def dc_layer(masks, x_rec, x_alised, *, precision=None):
    """Pallas implementation of DC_layer.forward.  Inputs are NCHW (B,2,H,W).

    precision: optional lax.Precision for the MXU dots (None = default MXU
    precision with f32 accumulation; lax.Precision.HIGHEST for strict f32).
    """
    B, C, H, W = x_rec.shape
    assert C == 2 and masks.shape == x_rec.shape == x_alised.shape

    _f32 = lambda a: a if a.dtype == jnp.float32 else a.astype(jnp.float32)
    masks, x_rec, x_alised = _f32(masks), _f32(x_rec), _f32(x_alised)
    # TODO(synk): optionally store images / DFT matrices as bf16 (f32 accum) to
    # halve HBM traffic and VMEM footprint when DEFAULT MXU precision suffices.

    # Shifted (i)DFT matrices (pre-transposed for right-multiplication) plus
    # precomputed Karatsuba sums -> 12 small constant inputs.
    # TODO(synk): zero-pad H/W that are not multiples of the MXU tile (128 on
    # v5e, 256 on v6e/v7x) and crop after, to avoid idle MXU columns.
    mats = (_mat_triplet(_shifted_dft_matrix(W, inverse=False))    # A_W^T
            + _mat_triplet(_shifted_dft_matrix(H, inverse=False))  # A_H^T
            + _mat_triplet(_shifted_dft_matrix(H, inverse=True))   # B_H^T
            + _mat_triplet(_shifted_dft_matrix(W, inverse=True)))  # B_W^T

    # ---- VMEM sizing -------------------------------------------------------
    # 12 resident constant matrices (single-buffered) + double-buffered I/O
    # blocks (3 inputs + 1 output, each (tb,2,H,W) f32) + ~14 f32 (tb,H,W)
    # planes of complex intermediates / Karatsuba temporaries.
    mat_bytes = 4 * 6 * (H * H + W * W)

    def footprint(t):
        io_bytes = 2 * 4 * (t * 2 * H * W * 4)   # double-buffered I/O blocks
        tmp_bytes = 14 * (t * H * W * 4)         # in-kernel temporaries (est.)
        return mat_bytes + io_bytes + tmp_bytes

    vmem_cap = _vmem_capacity_bytes()
    hard_cap = int(vmem_cap * 0.70)              # headroom for compiler scratch
    budget = min(hard_cap, 45 << 20) - (2 << 20)  # conservative: fits v5e/v6e/v7x

    # Batch tile: largest divisor of B that fits the budget while keeping the
    # grid at >= 4 steps (>= 2 for B == 2) so v7x megacore sharding and
    # DMA/compute pipelining stay alive.
    min_steps = 4 if B >= 4 else B
    tb = 1
    for d in range(1, B + 1):
        if B % d == 0 and (B // d) >= min_steps and footprint(d) <= budget:
            tb = d
    # TODO(synk): add an H/W tiling fallback when even tb=1 exceeds the budget
    # (f32 images with H = W >= ~512).

    vmem_limit = int(min(max(footprint(tb) + (4 << 20), 16 << 20), hard_cap))

    # Constants: whole-array VMEM residency, no per-step double buffering.
    mat_spec = pl.BlockSpec(memory_space=pltpu.MemorySpace.VMEM)
    img_spec = pl.BlockSpec((tb, 2, H, W), lambda b: (b, 0, 0, 0))

    return pl.pallas_call(
        _make_dc_kernel(precision),
        out_shape=jax.ShapeDtypeStruct((B, 2, H, W), jnp.float32),
        grid=(B // tb,),
        in_specs=[mat_spec] * 12 + [img_spec, img_spec, img_spec],
        out_specs=img_spec,
        compiler_params=pltpu.CompilerParams(
            dimension_semantics=("parallel",),
            vmem_limit_bytes=vmem_limit),
    )(*mats, masks, x_rec, x_alised)


def _reference_dc(masks, x_rec, x_alised):
    """Pure-JAX reference reproducing the PyTorch semantics via jnp.fft."""
    def tfm(x, inverse=False):
        cplx = x[:, 0] + 1j * x[:, 1]
        cplx = jnp.fft.ifftshift(cplx, axes=(-2, -1))
        cplx = (jnp.fft.ifft2(cplx, norm="ortho") if inverse
                else jnp.fft.fft2(cplx, norm="ortho"))
        cplx = jnp.fft.fftshift(cplx, axes=(-2, -1))
        return jnp.stack([cplx.real, cplx.imag], axis=1)

    x_tran = tfm(x_rec)
    x_under = tfm(x_alised)
    out = (1.0 - masks) * x_tran + x_under
    return tfm(out, inverse=True)


if __name__ == "__main__":
    key = jax.random.PRNGKey(0)
    k1, k2, k3 = jax.random.split(key, 3)
    B, H, W = 2, 16, 16

    x_rec = jax.random.normal(k1, (B, 2, H, W), dtype=jnp.float32)
    x_alised = jax.random.normal(k2, (B, 2, H, W), dtype=jnp.float32)
    # Binary undersampling mask, same for real/imag channels.
    m = (jax.random.uniform(k3, (B, 1, H, W)) < 0.5).astype(jnp.float32)
    masks = jnp.broadcast_to(m, (B, 2, H, W))

    out = dc_layer(masks, x_rec, x_alised)
    jax.block_until_ready(out)

    ref = _reference_dc(masks, x_rec, x_alised)
    np.testing.assert_allclose(np.asarray(out), np.asarray(ref),
                               atol=1e-3, rtol=1e-3)
    print("KERNEL_OK")
</pallas_src>

<mosaic_0001>
module attributes {stable_mosaic.version = 11 : i64} {
  func.func @kernel(%arg0: i32, %arg1: memref<16x16xf32, #tpu.memory_space<vmem>>, %arg2: memref<16x16xf32, #tpu.memory_space<vmem>>, %arg3: memref<16x16xf32, #tpu.memory_space<vmem>>, %arg4: memref<16x16xf32, #tpu.memory_space<vmem>>, %arg5: memref<16x16xf32, #tpu.memory_space<vmem>>, %arg6: memref<16x16xf32, #tpu.memory_space<vmem>>, %arg7: memref<16x16xf32, #tpu.memory_space<vmem>>, %arg8: memref<16x16xf32, #tpu.memory_space<vmem>>, %arg9: memref<16x16xf32, #tpu.memory_space<vmem>>, %arg10: memref<16x16xf32, #tpu.memory_space<vmem>>, %arg11: memref<16x16xf32, #tpu.memory_space<vmem>>, %arg12: memref<16x16xf32, #tpu.memory_space<vmem>>, %arg13: memref<1x2x16x16xf32, #tpu.memory_space<vmem>>, %arg14: memref<1x2x16x16xf32, #tpu.memory_space<vmem>>, %arg15: memref<1x2x16x16xf32, #tpu.memory_space<vmem>>, %arg16: memref<1x2x16x16xf32, #tpu.memory_space<vmem>>) attributes {dimension_semantics = [#tpu.dimension_semantics<parallel>], iteration_bounds = array<i64: 2>, scalar_prefetch = 0 : i64, scratch_operands = 0 : i64, tpu.core_type = #tpu.core_type<tc>, window_params = [{pipeline_mode = #tpu.pipeline_mode<synchronous>, transform_indices = @transform_0, window_bounds = array<i64: 16, 16>}, {pipeline_mode = #tpu.pipeline_mode<synchronous>, transform_indices = @transform_1, window_bounds = array<i64: 16, 16>}, {pipeline_mode = #tpu.pipeline_mode<synchronous>, transform_indices = @transform_2, window_bounds = array<i64: 16, 16>}, {pipeline_mode = #tpu.pipeline_mode<synchronous>, transform_indices = @transform_3, window_bounds = array<i64: 16, 16>}, {pipeline_mode = #tpu.pipeline_mode<synchronous>, transform_indices = @transform_4, window_bounds = array<i64: 16, 16>}, {pipeline_mode = #tpu.pipeline_mode<synchronous>, transform_indices = @transform_5, window_bounds = array<i64: 16, 16>}, {pipeline_mode = #tpu.pipeline_mode<synchronous>, transform_indices = @transform_6, window_bounds = array<i64: 16, 16>}, {pipeline_mode = #tpu.pipeline_mode<synchronous>, transform_indices = @transform_7, window_bounds = array<i64: 16, 16>}, {pipeline_mode = #tpu.pipeline_mode<synchronous>, transform_indices = @transform_8, window_bounds = array<i64: 16, 16>}, {pipeline_mode = #tpu.pipeline_mode<synchronous>, transform_indices = @transform_9, window_bounds = array<i64: 16, 16>}, {pipeline_mode = #tpu.pipeline_mode<synchronous>, transform_indices = @transform_10, window_bounds = array<i64: 16, 16>}, {pipeline_mode = #tpu.pipeline_mode<synchronous>, transform_indices = @transform_11, window_bounds = array<i64: 16, 16>}, {transform_indices = @transform_12, window_bounds = array<i64: 1, 2, 16, 16>}, {transform_indices = @transform_13, window_bounds = array<i64: 1, 2, 16, 16>}, {transform_indices = @transform_14, window_bounds = array<i64: 1, 2, 16, 16>}, {transform_indices = @transform_15, window_bounds = array<i64: 1, 2, 16, 16>}]} {
    %c0 = arith.constant 0 : index
    %c0_0 = arith.constant 0 : index
    %c0_1 = arith.constant 0 : index
    %c0_2 = arith.constant 0 : index
    %0 = vector.load %arg14[%c0, %c0_0, %c0_1, %c0_2] : memref<1x2x16x16xf32, #tpu.memory_space<vmem>>, vector<1x1x16x16xf32>
    %1 = vector.shape_cast %0 : vector<1x1x16x16xf32> to vector<1x16x16xf32>
    %2 = vector.shape_cast %1 : vector<1x16x16xf32> to vector<16x16xf32>
    %c0_3 = arith.constant 0 : index
    %c1 = arith.constant 1 : index
    %c0_4 = arith.constant 0 : index
    %c0_5 = arith.constant 0 : index
    %3 = vector.load %arg14[%c0_3, %c1, %c0_4, %c0_5] : memref<1x2x16x16xf32, #tpu.memory_space<vmem>>, vector<1x1x16x16xf32>
    %4 = vector.shape_cast %3 : vector<1x1x16x16xf32> to vector<1x16x16xf32>
    %5 = vector.shape_cast %4 : vector<1x16x16xf32> to vector<16x16xf32>
    %c0_6 = arith.constant 0 : index
    %c0_7 = arith.constant 0 : index
    %6 = vector.load %arg1[%c0_6, %c0_7] : memref<16x16xf32, #tpu.memory_space<vmem>>, vector<16x16xf32>
    %cst = arith.constant dense<0.000000e+00> : vector<16x16xf32>
    %7 = tpu.matmul %2, %6, %cst {dimension_numbers = #tpu.dot_dimension_numbers<[1], [0], [0], [1], [0, 0, 1, 1], [], []>} : vector<16x16xf32>, vector<16x16xf32>, vector<16x16xf32> -> vector<16x16xf32>
    %c0_8 = arith.constant 0 : index
    %c0_9 = arith.constant 0 : index
    %8 = vector.load %arg2[%c0_8, %c0_9] : memref<16x16xf32, #tpu.memory_space<vmem>>, vector<16x16xf32>
    %cst_10 = arith.constant dense<0.000000e+00> : vector<16x16xf32>
    %9 = tpu.matmul %5, %8, %cst_10 {dimension_numbers = #tpu.dot_dimension_numbers<[1], [0], [0], [1], [0, 0, 1, 1], [], []>} : vector<16x16xf32>, vector<16x16xf32>, vector<16x16xf32> -> vector<16x16xf32>
    %10 = arith.addf %2, %5 : vector<16x16xf32>
    %c0_11 = arith.constant 0 : index
    %c0_12 = arith.constant 0 : index
    %11 = vector.load %arg3[%c0_11, %c0_12] : memref<16x16xf32, #tpu.memory_space<vmem>>, vector<16x16xf32>
    %cst_13 = arith.constant dense<0.000000e+00> : vector<16x16xf32>
    %12 = tpu.matmul %10, %11, %cst_13 {dimension_numbers = #tpu.dot_dimension_numbers<[1], [0], [0], [1], [0, 0, 1, 1], [], []>} : vector<16x16xf32>, vector<16x16xf32>, vector<16x16xf32> -> vector<16x16xf32>
    %13 = arith.subf %7, %9 : vector<16x16xf32>
    %14 = arith.subf %12, %7 : vector<16x16xf32>
    %15 = arith.subf %14, %9 : vector<16x16xf32>
    %16 = vector.shape_cast %13 : vector<16x16xf32> to vector<1x16x16xf32>
    %17 = tpu.transpose %16, [0, 2, 1] : vector<1x16x16xf32> -> vector<1x16x16xf32>
    %18 = vector.shape_cast %17 : vector<1x16x16xf32> to vector<16x16xf32>
    %19 = vector.shape_cast %15 : vector<16x16xf32> to vector<1x16x16xf32>
    %20 = tpu.transpose %19, [0, 2, 1] : vector<1x16x16xf32> -> vector<1x16x16xf32>
    %21 = vector.shape_cast %20 : vector<1x16x16xf32> to vector<16x16xf32>
    %c0_14 = arith.constant 0 : index
    %c0_15 = arith.constant 0 : index
    %22 = vector.load %arg4[%c0_14, %c0_15] : memref<16x16xf32, #tpu.memory_space<vmem>>, vector<16x16xf32>
    %cst_16 = arith.constant dense<0.000000e+00> : vector<16x16xf32>
    %23 = tpu.matmul %18, %22, %cst_16 {dimension_numbers = #tpu.dot_dimension_numbers<[1], [0], [0], [1], [0, 0, 1, 1], [], []>} : vector<16x16xf32>, vector<16x16xf32>, vector<16x16xf32> -> vector<16x16xf32>
    %c0_17 = arith.constant 0 : index
    %c0_18 = arith.constant 0 : index
    %24 = vector.load %arg5[%c0_17, %c0_18] : memref<16x16xf32, #tpu.memory_space<vmem>>, vector<16x16xf32>
    %cst_19 = arith.constant dense<0.000000e+00> : vector<16x16xf32>
    %25 = tpu.matmul %21, %24, %cst_19 {dimension_numbers = #tpu.dot_dimension_numbers<[1], [0], [0], [1], [0, 0, 1, 1], [], []>} : vector<16x16xf32>, vector<16x16xf32>, vector<16x16xf32> -> vector<16x16xf32>
    %26 = arith.addf %18, %21 : vector<16x16xf32>
    %c0_20 = arith.constant 0 : index
    %c0_21 = arith.constant 0 : index
    %27 = vector.load %arg6[%c0_20, %c0_21] : memref<16x16xf32, #tpu.memory_space<vmem>>, vector<16x16xf32>
    %cst_22 = arith.constant dense<0.000000e+00> : vector<16x16xf32>
    %28 = tpu.matmul %26, %27, %cst_22 {dimension_numbers = #tpu.dot_dimension_numbers<[1], [0], [0], [1], [0, 0, 1, 1], [], []>} : vector<16x16xf32>, vector<16x16xf32>, vector<16x16xf32> -> vector<16x16xf32>
    %29 = arith.subf %23, %25 : vector<16x16xf32>
    %30 = arith.subf %28, %23 : vector<16x16xf32>
    %31 = arith.subf %30, %25 : vector<16x16xf32>
    %32 = vector.shape_cast %29 : vector<16x16xf32> to vector<1x16x16xf32>
    %33 = vector.shape_cast %31 : vector<16x16xf32> to vector<1x16x16xf32>
    %c0_23 = arith.constant 0 : index
    %c0_24 = arith.constant 0 : index
    %c0_25 = arith.constant 0 : index
    %c0_26 = arith.constant 0 : index
    %34 = vector.load %arg15[%c0_23, %c0_24, %c0_25, %c0_26] : memref<1x2x16x16xf32, #tpu.memory_space<vmem>>, vector<1x1x16x16xf32>
    %35 = vector.shape_cast %34 : vector<1x1x16x16xf32> to vector<1x16x16xf32>
    %36 = vector.shape_cast %35 : vector<1x16x16xf32> to vector<16x16xf32>
    %c0_27 = arith.constant 0 : index
    %c1_28 = arith.constant 1 : index
    %c0_29 = arith.constant 0 : index
    %c0_30 = arith.constant 0 : index
    %37 = vector.load %arg15[%c0_27, %c1_28, %c0_29, %c0_30] : memref<1x2x16x16xf32, #tpu.memory_space<vmem>>, vector<1x1x16x16xf32>
    %38 = vector.shape_cast %37 : vector<1x1x16x16xf32> to vector<1x16x16xf32>
    %39 = vector.shape_cast %38 : vector<1x16x16xf32> to vector<16x16xf32>
    %c0_31 = arith.constant 0 : index
    %c0_32 = arith.constant 0 : index
    %40 = vector.load %arg1[%c0_31, %c0_32] : memref<16x16xf32, #tpu.memory_space<vmem>>, vector<16x16xf32>
    %cst_33 = arith.constant dense<0.000000e+00> : vector<16x16xf32>
    %41 = tpu.matmul %36, %40, %cst_33 {dimension_numbers = #tpu.dot_dimension_numbers<[1], [0], [0], [1], [0, 0, 1, 1], [], []>} : vector<16x16xf32>, vector<16x16xf32>, vector<16x16xf32> -> vector<16x16xf32>
    %c0_34 = arith.constant 0 : index
    %c0_35 = arith.constant 0 : index
    %42 = vector.load %arg2[%c0_34, %c0_35] : memref<16x16xf32, #tpu.memory_space<vmem>>, vector<16x16xf32>
    %cst_36 = arith.constant dense<0.000000e+00> : vector<16x16xf32>
    %43 = tpu.matmul %39, %42, %cst_36 {dimension_numbers = #tpu.dot_dimension_numbers<[1], [0], [0], [1], [0, 0, 1, 1], [], []>} : vector<16x16xf32>, vector<16x16xf32>, vector<16x16xf32> -> vector<16x16xf32>
    %44 = arith.addf %36, %39 : vector<16x16xf32>
    %c0_37 = arith.constant 0 : index
    %c0_38 = arith.constant 0 : index
    %45 = vector.load %arg3[%c0_37, %c0_38] : memref<16x16xf32, #tpu.memory_space<vmem>>, vector<16x16xf32>
    %cst_39 = arith.constant dense<0.000000e+00> : vector<16x16xf32>
    %46 = tpu.matmul %44, %45, %cst_39 {dimension_numbers = #tpu.dot_dimension_numbers<[1], [0], [0], [1], [0, 0, 1, 1], [], []>} : vector<16x16xf32>, vector<16x16xf32>, vector<16x16xf32> -> vector<16x16xf32>
    %47 = arith.subf %41, %43 : vector<16x16xf32>
    %48 = arith.subf %46, %41 : vector<16x16xf32>
    %49 = arith.subf %48, %43 : vector<16x16xf32>
    %50 = vector.shape_cast %47 : vector<16x16xf32> to vector<1x16x16xf32>
    %51 = tpu.transpose %50, [0, 2, 1] : vector<1x16x16xf32> -> vector<1x16x16xf32>
    %52 = vector.shape_cast %51 : vector<1x16x16xf32> to vector<16x16xf32>
    %53 = vector.shape_cast %49 : vector<16x16xf32> to vector<1x16x16xf32>
    %54 = tpu.transpose %53, [0, 2, 1] : vector<1x16x16xf32> -> vector<1x16x16xf32>
    %55 = vector.shape_cast %54 : vector<1x16x16xf32> to vector<16x16xf32>
    %c0_40 = arith.constant 0 : index
    %c0_41 = arith.constant 0 : index
    %56 = vector.load %arg4[%c0_40, %c0_41] : memref<16x16xf32, #tpu.memory_space<vmem>>, vector<16x16xf32>
    %cst_42 = arith.constant dense<0.000000e+00> : vector<16x16xf32>
    %57 = tpu.matmul %52, %56, %cst_42 {dimension_numbers = #tpu.dot_dimension_numbers<[1], [0], [0], [1], [0, 0, 1, 1], [], []>} : vector<16x16xf32>, vector<16x16xf32>, vector<16x16xf32> -> vector<16x16xf32>
    %c0_43 = arith.constant 0 : index
    %c0_44 = arith.constant 0 : index
    %58 = vector.load %arg5[%c0_43, %c0_44] : memref<16x16xf32, #tpu.memory_space<vmem>>, vector<16x16xf32>
    %cst_45 = arith.constant dense<0.000000e+00> : vector<16x16xf32>
    %59 = tpu.matmul %55, %58, %cst_45 {dimension_numbers = #tpu.dot_dimension_numbers<[1], [0], [0], [1], [0, 0, 1, 1], [], []>} : vector<16x16xf32>, vector<16x16xf32>, vector<16x16xf32> -> vector<16x16xf32>
    %60 = arith.addf %52, %55 : vector<16x16xf32>
    %c0_46 = arith.constant 0 : index
    %c0_47 = arith.constant 0 : index
    %61 = vector.load %arg6[%c0_46, %c0_47] : memref<16x16xf32, #tpu.memory_space<vmem>>, vector<16x16xf32>
    %cst_48 = arith.constant dense<0.000000e+00> : vector<16x16xf32>
    %62 = tpu.matmul %60, %61, %cst_48 {dimension_numbers = #tpu.dot_dimension_numbers<[1], [0], [0], [1], [0, 0, 1, 1], [], []>} : vector<16x16xf32>, vector<16x16xf32>, vector<16x16xf32> -> vector<16x16xf32>
    %63 = arith.subf %57, %59 : vector<16x16xf32>
    %64 = arith.subf %62, %57 : vector<16x16xf32>
    %65 = arith.subf %64, %59 : vector<16x16xf32>
    %66 = vector.shape_cast %63 : vector<16x16xf32> to vector<1x16x16xf32>
    %67 = vector.shape_cast %65 : vector<16x16xf32> to vector<1x16x16xf32>
    %c0_49 = arith.constant 0 : index
    %c0_50 = arith.constant 0 : index
    %c0_51 = arith.constant 0 : index
    %c0_52 = arith.constant 0 : index
    %68 = vector.load %arg13[%c0_49, %c0_50, %c0_51, %c0_52] : memref<1x2x16x16xf32, #tpu.memory_space<vmem>>, vector<1x1x16x16xf32>
    %69 = vector.shape_cast %68 : vector<1x1x16x16xf32> to vector<1x16x16xf32>
    %70 = tpu.transpose %69, [0, 2, 1] : vector<1x16x16xf32> -> vector<1x16x16xf32>
    %c0_53 = arith.constant 0 : index
    %c1_54 = arith.constant 1 : index
    %c0_55 = arith.constant 0 : index
    %c0_56 = arith.constant 0 : index
    %71 = vector.load %arg13[%c0_53, %c1_54, %c0_55, %c0_56] : memref<1x2x16x16xf32, #tpu.memory_space<vmem>>, vector<1x1x16x16xf32>
    %72 = vector.shape_cast %71 : vector<1x1x16x16xf32> to vector<1x16x16xf32>
    %73 = tpu.transpose %72, [0, 2, 1] : vector<1x16x16xf32> -> vector<1x16x16xf32>
    %cst_57 = arith.constant 1.000000e+00 : f32
    %74 = vector.broadcast %cst_57 : f32 to vector<1x16x16xf32>
    %75 = arith.subf %74, %70 : vector<1x16x16xf32>
    %76 = arith.mulf %75, %32 : vector<1x16x16xf32>
    %77 = arith.addf %76, %66 : vector<1x16x16xf32>
    %cst_58 = arith.constant 1.000000e+00 : f32
    %78 = vector.broadcast %cst_58 : f32 to vector<1x16x16xf32>
    %79 = arith.subf %78, %73 : vector<1x16x16xf32>
    %80 = arith.mulf %79, %33 : vector<1x16x16xf32>
    %81 = arith.addf %80, %67 : vector<1x16x16xf32>
    %82 = vector.shape_cast %77 : vector<1x16x16xf32> to vector<16x16xf32>
    %83 = vector.shape_cast %81 : vector<1x16x16xf32> to vector<16x16xf32>
    %c0_59 = arith.constant 0 : index
    %c0_60 = arith.constant 0 : index
    %84 = vector.load %arg7[%c0_59, %c0_60] : memref<16x16xf32, #tpu.memory_space<vmem>>, vector<16x16xf32>
    %cst_61 = arith.constant dense<0.000000e+00> : vector<16x16xf32>
    %85 = tpu.matmul %82, %84, %cst_61 {dimension_numbers = #tpu.dot_dimension_numbers<[1], [0], [0], [1], [0, 0, 1, 1], [], []>} : vector<16x16xf32>, vector<16x16xf32>, vector<16x16xf32> -> vector<16x16xf32>
    %c0_62 = arith.constant 0 : index
    %c0_63 = arith.constant 0 : index
    %86 = vector.load %arg8[%c0_62, %c0_63] : memref<16x16xf32, #tpu.memory_space<vmem>>, vector<16x16xf32>
    %cst_64 = arith.constant dense<0.000000e+00> : vector<16x16xf32>
    %87 = tpu.matmul %83, %86, %cst_64 {dimension_numbers = #tpu.dot_dimension_numbers<[1], [0], [0], [1], [0, 0, 1, 1], [], []>} : vector<16x16xf32>, vector<16x16xf32>, vector<16x16xf32> -> vector<16x16xf32>
    %88 = arith.addf %82, %83 : vector<16x16xf32>
    %c0_65 = arith.constant 0 : index
    %c0_66 = arith.constant 0 : index
    %89 = vector.load %arg9[%c0_65, %c0_66] : memref<16x16xf32, #tpu.memory_space<vmem>>, vector<16x16xf32>
    %cst_67 = arith.constant dense<0.000000e+00> : vector<16x16xf32>
    %90 = tpu.matmul %88, %89, %cst_67 {dimension_numbers = #tpu.dot_dimension_numbers<[1], [0], [0], [1], [0, 0, 1, 1], [], []>} : vector<16x16xf32>, vector<16x16xf32>, vector<16x16xf32> -> vector<16x16xf32>
    %91 = arith.subf %85, %87 : vector<16x16xf32>
    %92 = arith.subf %90, %85 : vector<16x16xf32>
    %93 = arith.subf %92, %87 : vector<16x16xf32>
    %94 = vector.shape_cast %91 : vector<16x16xf32> to vector<1x16x16xf32>
    %95 = tpu.transpose %94, [0, 2, 1] : vector<1x16x16xf32> -> vector<1x16x16xf32>
    %96 = vector.shape_cast %95 : vector<1x16x16xf32> to vector<16x16xf32>
    %97 = vector.shape_cast %93 : vector<16x16xf32> to vector<1x16x16xf32>
    %98 = tpu.transpose %97, [0, 2, 1] : vector<1x16x16xf32> -> vector<1x16x16xf32>
    %99 = vector.shape_cast %98 : vector<1x16x16xf32> to vector<16x16xf32>
    %c0_68 = arith.constant 0 : index
    %c0_69 = arith.constant 0 : index
    %100 = vector.load %arg10[%c0_68, %c0_69] : memref<16x16xf32, #tpu.memory_space<vmem>>, vector<16x16xf32>
    %cst_70 = arith.constant dense<0.000000e+00> : vector<16x16xf32>
    %101 = tpu.matmul %96, %100, %cst_70 {dimension_numbers = #tpu.dot_dimension_numbers<[1], [0], [0], [1], [0, 0, 1, 1], [], []>} : vector<16x16xf32>, vector<16x16xf32>, vector<16x16xf32> -> vector<16x16xf32>
    %c0_71 = arith.constant 0 : index
    %c0_72 = arith.constant 0 : index
    %102 = vector.load %arg11[%c0_71, %c0_72] : memref<16x16xf32, #tpu.memory_space<vmem>>, vector<16x16xf32>
    %cst_73 = arith.constant dense<0.000000e+00> : vector<16x16xf32>
    %103 = tpu.matmul %99, %102, %cst_73 {dimension_numbers = #tpu.dot_dimension_numbers<[1], [0], [0], [1], [0, 0, 1, 1], [], []>} : vector<16x16xf32>, vector<16x16xf32>, vector<16x16xf32> -> vector<16x16xf32>
    %104 = arith.addf %96, %99 : vector<16x16xf32>
    %c0_74 = arith.constant 0 : index
    %c0_75 = arith.constant 0 : index
    %105 = vector.load %arg12[%c0_74, %c0_75] : memref<16x16xf32, #tpu.memory_space<vmem>>, vector<16x16xf32>
    %cst_76 = arith.constant dense<0.000000e+00> : vector<16x16xf32>
    %106 = tpu.matmul %104, %105, %cst_76 {dimension_numbers = #tpu.dot_dimension_numbers<[1], [0], [0], [1], [0, 0, 1, 1], [], []>} : vector<16x16xf32>, vector<16x16xf32>, vector<16x16xf32> -> vector<16x16xf32>
    %107 = arith.subf %101, %103 : vector<16x16xf32>
    %108 = arith.subf %106, %101 : vector<16x16xf32>
    %109 = arith.subf %108, %103 : vector<16x16xf32>
    %110 = vector.shape_cast %107 : vector<16x16xf32> to vector<1x16x16xf32>
    %c0_77 = arith.constant 0 : index
    %c0_78 = arith.constant 0 : index
    %c0_79 = arith.constant 0 : index
    %c0_80 = arith.constant 0 : index
    %111 = vector.load %arg16[%c0_77, %c0_78, %c0_79, %c0_80] : memref<1x2x16x16xf32, #tpu.memory_space<vmem>>, vector<1x1x16x16xf32>
    %112 = vector.shape_cast %111 : vector<1x1x16x16xf32> to vector<1x16x16xf32>
    %113 = vector.shape_cast %110 : vector<1x16x16xf32> to vector<1x1x16x16xf32>
    tpu.vector_store %arg16[%c0_77, %c0_78, %c0_79, %c0_80], %113 {strides = array<i32>} : memref<1x2x16x16xf32, #tpu.memory_space<vmem>>, vector<1x1x16x16xf32>,
    %114 = vector.shape_cast %109 : vector<16x16xf32> to vector<1x16x16xf32>
    %c0_81 = arith.constant 0 : index
    %c1_82 = arith.constant 1 : index
    %c0_83 = arith.constant 0 : index
    %c0_84 = arith.constant 0 : index
    %115 = vector.load %arg16[%c0_81, %c1_82, %c0_83, %c0_84] : memref<1x2x16x16xf32, #tpu.memory_space<vmem>>, vector<1x1x16x16xf32>
    %116 = vector.shape_cast %115 : vector<1x1x16x16xf32> to vector<1x16x16xf32>
    %117 = vector.shape_cast %114 : vector<1x16x16xf32> to vector<1x1x16x16xf32>
    tpu.vector_store %arg16[%c0_81, %c1_82, %c0_83, %c0_84], %117 {strides = array<i32>} : memref<1x2x16x16xf32, #tpu.memory_space<vmem>>, vector<1x1x16x16xf32>,
    return
  }
  func.func @transform_0(%arg0: i32) -> (i32, i32) {
    %c0_i32 = arith.constant 0 : i32
    %c0_i32_0 = arith.constant 0 : i32
    %c0_i32_1 = arith.constant 0 : i32
    return %c0_i32, %c0_i32_0 : i32, i32
  }
  func.func @transform_1(%arg0: i32) -> (i32, i32) {
    %c0_i32 = arith.constant 0 : i32
    %c0_i32_0 = arith.constant 0 : i32
    %c0_i32_1 = arith.constant 0 : i32
    return %c0_i32, %c0_i32_0 : i32, i32
  }
  func.func @transform_2(%arg0: i32) -> (i32, i32) {
    %c0_i32 = arith.constant 0 : i32
    %c0_i32_0 = arith.constant 0 : i32
    %c0_i32_1 = arith.constant 0 : i32
    return %c0_i32, %c0_i32_0 : i32, i32
  }
  func.func @transform_3(%arg0: i32) -> (i32, i32) {
    %c0_i32 = arith.constant 0 : i32
    %c0_i32_0 = arith.constant 0 : i32
    %c0_i32_1 = arith.constant 0 : i32
    return %c0_i32, %c0_i32_0 : i32, i32
  }
  func.func @transform_4(%arg0: i32) -> (i32, i32) {
    %c0_i32 = arith.constant 0 : i32
    %c0_i32_0 = arith.constant 0 : i32
    %c0_i32_1 = arith.constant 0 : i32
    return %c0_i32, %c0_i32_0 : i32, i32
  }
  func.func @transform_5(%arg0: i32) -> (i32, i32) {
    %c0_i32 = arith.constant 0 : i32
    %c0_i32_0 = arith.constant 0 : i32
    %c0_i32_1 = arith.constant 0 : i32
    return %c0_i32, %c0_i32_0 : i32, i32
  }
  func.func @transform_6(%arg0: i32) -> (i32, i32) {
    %c0_i32 = arith.constant 0 : i32
    %c0_i32_0 = arith.constant 0 : i32
    %c0_i32_1 = arith.constant 0 : i32
    return %c0_i32, %c0_i32_0 : i32, i32
  }
  func.func @transform_7(%arg0: i32) -> (i32, i32) {
    %c0_i32 = arith.constant 0 : i32
    %c0_i32_0 = arith.constant 0 : i32
    %c0_i32_1 = arith.constant 0 : i32
    return %c0_i32, %c0_i32_0 : i32, i32
  }
  func.func @transform_8(%arg0: i32) -> (i32, i32) {
    %c0_i32 = arith.constant 0 : i32
    %c0_i32_0 = arith.constant 0 : i32
    %c0_i32_1 = arith.constant 0 : i32
    return %c0_i32, %c0_i32_0 : i32, i32
  }
  func.func @transform_9(%arg0: i32) -> (i32, i32) {
    %c0_i32 = arith.constant 0 : i32
    %c0_i32_0 = arith.constant 0 : i32
    %c0_i32_1 = arith.constant 0 : i32
    return %c0_i32, %c0_i32_0 : i32, i32
  }
  func.func @transform_10(%arg0: i32) -> (i32, i32) {
    %c0_i32 = arith.constant 0 : i32
    %c0_i32_0 = arith.constant 0 : i32
    %c0_i32_1 = arith.constant 0 : i32
    return %c0_i32, %c0_i32_0 : i32, i32
  }
  func.func @transform_11(%arg0: i32) -> (i32, i32) {
    %c0_i32 = arith.constant 0 : i32
    %c0_i32_0 = arith.constant 0 : i32
    %c0_i32_1 = arith.constant 0 : i32
    return %c0_i32, %c0_i32_0 : i32, i32
  }
  func.func @transform_12(%arg0: i32) -> (i32, i32, i32, i32) {
    %c0_i32 = arith.constant 0 : i32
    %c0_i32_0 = arith.constant 0 : i32
    %c0_i32_1 = arith.constant 0 : i32
    %c0_i32_2 = arith.constant 0 : i32
    return %arg0, %c0_i32, %c0_i32_0, %c0_i32_1 : i32, i32, i32, i32
  }
  func.func @transform_13(%arg0: i32) -> (i32, i32, i32, i32) {
    %c0_i32 = arith.constant 0 : i32
    %c0_i32_0 = arith.constant 0 : i32
    %c0_i32_1 = arith.constant 0 : i32
    %c0_i32_2 = arith.constant 0 : i32
    return %arg0, %c0_i32, %c0_i32_0, %c0_i32_1 : i32, i32, i32, i32
  }
  func.func @transform_14(%arg0: i32) -> (i32, i32, i32, i32) {
    %c0_i32 = arith.constant 0 : i32
    %c0_i32_0 = arith.constant 0 : i32
    %c0_i32_1 = arith.constant 0 : i32
    %c0_i32_2 = arith.constant 0 : i32
    return %arg0, %c0_i32, %c0_i32_0, %c0_i32_1 : i32, i32, i32, i32
  }
  func.func @transform_15(%arg0: i32) -> (i32, i32, i32, i32) {
    %c0_i32 = arith.constant 0 : i32
    %c0_i32_0 = arith.constant 0 : i32
    %c0_i32_1 = arith.constant 0 : i32
    %c0_i32_2 = arith.constant 0 : i32
    return %arg0, %c0_i32, %c0_i32_0, %c0_i32_1 : i32, i32, i32, i32
  }
}

</mosaic_0001>

<bundles_post_ra>
// kernel: tpu_custom_call.1
= control target key start
LH: loop header
LB: loop body
LE: loop exit
PB: predicated region body
PF: predicated region fallthrough
CT: control target
= control target key end

     0   :  { %s4464_s0 = inlined_call_operand.hbm [shape: f32[16,16], index: 0, kind: input, shape index: {}]   ;;  %s4465_s1 = inlined_call_operand.hbm [shape: f32[16,16], index: 1, kind: input, shape index: {}]   ;;  %s4466_s2 = inlined_call_operand.hbm [shape: f32[16,16], index: 2, kind: input, shape index: {}]   ;;  %s4467_s3 = inlined_call_operand.hbm [shape: f32[16,16], index: 3, kind: input, shape index: {}]   ;;  %s4468_s4 = inlined_call_operand.hbm [shape: f32[16,16], index: 4, kind: input, shape index: {}]   ;;  %s4469_s5 = inlined_call_operand.vmem [shape: f32[16,16], index: 5, kind: input, shape index: {}]   ;;  %s4470_s6 = inlined_call_operand.hbm [shape: f32[16,16], index: 6, kind: input, shape index: {}]   ;;  %s4471_s7 = inlined_call_operand.hbm [shape: f32[16,16], index: 7, kind: input, shape index: {}]   ;;  %s4472_s8 = inlined_call_operand.hbm [shape: f32[16,16], index: 8, kind: input, shape index: {}]   ;;  %s4473_s9 = inlined_call_operand.vmem [shape: f32[16,16], index: 9, kind: input, shape index: {}]   ;;  %s4474_s10 = inlined_call_operand.hbm [shape: f32[16,16], index: 10, kind: input, shape index: {}]   ;;  %s4475_s11 = inlined_call_operand.hbm [shape: f32[16,16], index: 11, kind: input, shape index: {}]   ;;  %s4476_s12 = inlined_call_operand.hbm [shape: f32[2,2,16,16], index: 12, kind: input, shape index: {}]   ;;  %s4477_s13 = inlined_call_operand.hbm [shape: f32[2,2,16,16], index: 13, kind: input, shape index: {}]   ;;  %s4478_s14 = inlined_call_operand.hbm [shape: f32[2,2,16,16], index: 14, kind: input, shape index: {}]   ;;  %s4479_s15 = inlined_call_operand.hbm [shape: f32[2,2,16,16], index: 15, kind: output, shape index: {}]  }
   0x1   :  { %4518 = sst [smem:[#allocation42_spill]] %s4464_s0 }
   0x2   :  { %4519 = sst [smem:[#allocation43_spill]] %s4465_s1 }
   0x3   :  { %4520 = sst [smem:[#allocation44_spill]] %s4466_s2 }
   0x4   :  { %4521 = sst [smem:[#allocation45_spill]] %s4469_s5 }
   0x5   :  { %4522 = sst [smem:[#allocation46_spill]] %s4473_s9 }
   0x6   :  { %4523 = sst [smem:[#allocation47_spill]] %s4475_s11 }
   0x7   :  { %4524 = sst [smem:[#allocation48_spill]] %s4476_s12 }
   0x8   :  { %4525 = sst [smem:[#allocation49_spill]] %s4478_s14 }
   0x9   :  { %4526 = sst [smem:[#allocation50_spill]] %s4479_s15 }
   0xa   :  { %20 = vsyncpa [#allocation3], 0 }
   0xb   :  { %21 = vsyncpa [#allocation6], 0 }
   0xc   :  { %22 = vsyncpa [#allocation9], 0 }
   0xd   :  { %23 = vsyncpa [#allocation12], 0 }
   0xe   :  { %24 = vsyncpa [#allocation15], 0 }
   0xf   :  { %25 = vsyncpa [#allocation18], 0 }
  0x10   :  { %26 = vsyncpa [#allocation4], 0 }
  0x11   :  { %28 = vsyncpa [#allocation4 + $0x1], 0  ;;  %s3853_s18 = smov 0   ;;  %s3855_s19 = smov 0  }
  0x12   :  { %s3857_s20 = smov 0   ;;  %s3859_s21 = smov 0  }
  0x13 LB: > { %4527 = sst [smem:[#allocation31_spill]] %s3741_s18  ;;  %s3755_s22 = smov [#allocation2]   ;;  %s3753_s21 = sphi %s3859_s21, %s4593_s21   ;;  %s3749_s20 = sphi %s3857_s20, %s4596_s20   ;;  %s3745_s19 = sphi %s3855_s19, %s4595_s19   ;;  %s3741_s18 = sphi %s3853_s18, %s4594_s18  }
  0x14   : > { %4528 = sst [smem:[#allocation32_spill]] %s3745_s19  ;;  %s407_s23 = sshll.u32 %s3755_s22, 4  ;;  %s408_s23 = int_to_ptr.vmem [resolvable:$true] %s407_s23 }
  0x15   : > { %4529 = sst [smem:[#allocation33_spill]] %s3749_s20  ;;  %s3874_s24 = sadd.s32 4294967295, %s3753_s21  }
  0x16   : > { %4530 = sst [smem:[#allocation34_spill]] %s3753_s21  ;;  %p2772_p0 = scmp.ge.s32.totalorder %s3753_s21, 1 }
  0x17   : > { %4531 = sst [smem:[#allocation35_spill]] %s3874_s24  ;;  %p4482_p1 = scmp.eq.s32.totalorder %s3874_s24, 0 }
  0x18   : > { %p395_p2 = scmp.lt.s32.totalorder %s3753_s21, 3  ;;  %s4535_s0 = sld [smem:[#allocation42_spill]] }
  0x1a   : > { %p3879_p3 = pnand %p2772_p0, %p395_p2 }
  0x1c   : > { %s4532_s25 = scalar_select %p3879_p3, 1, 0 }
  0x1d   : > { %p3179_p5 = pneg %p3879_p3 }
  0x1e   : > { %4533 = sst [smem:[#allocation36_spill]] %s4532_s25  ;;  %s3293_s30 = scalar_lea.hbm %s4535_s0, 256 }
  0x1f   : > { %p3888_p6 = pnand %p3179_p5, %p4482_p1  ;;  %p3294_p7 = scmp.ne.s32.totalorder %s4535_s0, %s3293_s30 }
  0x20   : > { %p3300_p11 = scmp.lt.u32.totalorder %s3293_s30, %s4535_s0 }
  0x21   : > { %s4534_s26 = scalar_select %p3888_p6, 1, 0 }
  0x22   : > { %p3901_p8 = pneg %p3888_p6 }
  0x24   : > { %s4536_s22 = scalar_select %p3901_p8, 1, 0 }
  0x25   : > { %p3296_p9 = pnand %p3901_p8, %p3294_p7 }
  0x27   : > { %p3297_p10 = pneg %p3296_p9 }
  0x29   : > { %p3302_p12 = pnand %p3300_p11, %p3297_p10 }
  0x2b   : > { %3305 = shalt.err (!%p3302_p12)
}
  0x2c   : > { %s3306_s28 = scalar_lea.vmem %s408_s23, 256  ;;  %p3314_p5 = scmp.lt.s32.totalorder %s408_s23, %s408_s23 }
  0x2d   : > { %p3307_p13 = scmp.ne.s32.totalorder %s408_s23, %s3306_s28  ;;  %p3315_p4 = scmp.lt.s32.totalorder %s3306_s28, %s3306_s28 }
  0x2f   : > { %p3309_p0 = pnand %p3307_p13, %p3901_p8  ;;  %p3316_p1 = por %p3315_p4, %p3314_p5 }
  0x31   : > { %p3310_p2 = pneg %p3309_p0 }
  0x33   : > { %p3317_p3 = pnand %p3316_p1, %p3310_p2 }
  0x35   : > { %3320 = shalt.err (!%p3317_p3)
}
  0x36   : > { %s4484_s29 = smov 128   ;;  %s4486_s9 = smov 8  }
  0x37   : > { %3182 = dma.hbm_to_vmem [thread:$0]  (!%p3888_p6), %s4535_s0, 256, %s408_s23, [#allocation3], %s4484_s29, %s4484_s29, %s4486_s9  }
  0x38   : > { %s3921_s16 = sadd.s32 1, %s3753_s21   ;;  %s293_s17 = sadd.s32 1, %s3749_s20 }
  0x39   : > { %4537 = sst [smem:[#allocation37_spill]] %s3921_s16  ;;  %s290_s28 = ssub.s32 %s3753_s21, %s3921_s16 }
  0x3a   : > { %p300_p1 = scmp.ne.s32.totalorder %s3749_s20, %s3745_s19  ;;  %p291_p3 = scmp.eq.s32.totalorder %s290_s28, 0 }
  0x3b   : > { %p301_p4 = scmp.eq.s32.totalorder %s3753_s21, 0  ;;  %p306_p7 = scmp.ne.s32.totalorder %s3745_s19, %s3741_s18 }
  0x3c   : > { %p382_p9 = scmp.eq.s32.totalorder %s3874_s24, 1  ;;  %p4539_p11 = scmp.eq.s32.totalorder %s3874_s24, 0 }
  0x3d   : > { %s3933_s27 = scalar_select %p291_p3, %s3749_s20, %s293_s17  }
  0x3e   : > { %p302_p10 = por %p301_p4, %p300_p1  ;;  %p3937_p12 = por %p4539_p11, %p306_p7 }
  0x3f   : > { %4538 = sst [smem:[#allocation38_spill]] %s3933_s27  ;;  %p3941_p13 = por %p382_p9, %p300_p1 }
  0x40   : > { %s4540_s15 = scalar_select %p3937_p12, 1, 0 }
  0x41   : > { %s4542_s23 = scalar_select %p3941_p13, 1, 0 }
  0x42   : > { %4541 = sst [smem:[#allocation39_spill]] %s4540_s15  ;;  %s4544_s30 = sadd.s32 4294967294, %s3753_s21  }
  0x43   : > { %4543 = sst [smem:[#allocation40_spill]] %s4542_s23  ;;  %p388_p0 = scmp.eq.s32.totalorder %s4544_s30, 1 }
  0x44   : > { %p3234_p2 = scmp.lt.s32.totalorder %s3753_s21, 2  ;;  %s544_s29 = sand.u32 1, %s3753_s21  }
  0x45   : > { %p3949_p5 = por %p388_p0, %p306_p7  ;;  %s546_s17 = sand.u32 1, %s3749_s20  }
  0x46   : > { %s3955_s9 = sshll.u32 %s3753_s21, 9  ;;  %s3957_s0 = sshll.u32 %s546_s17, 5 }
  0x47   : > { %s4545_s28 = scalar_select %p3949_p5, 1, 0 }
  0x48   : > { %s4547_s12 = sld [smem:[#allocation48_spill]]  ;;  %p3965_p1 = pnand %p3234_p2, %p302_p10 }
  0x49   : > { %4546 = sst [smem:[#allocation41_spill]] %s4545_s28  ;;  %s548_s20 = scalar_lea.vmem [#allocation19], %s3957_s0 }
  0x4a   : > { %s4548_s30 = scalar_select %p3965_p1, 1, 0 }
  0x4b   : > { %s555_s21 = sshll.u32 %s548_s20, 4  ;;  %s3972_s17 = scalar_lea.sflag [#allocation3], %s544_s29  ;;  %s3970_s21 = int_to_ptr.vmem [resolvable:$true] %s555_s21 }
  0x4c   : > { %p3978_p4 = pneg %p3965_p1 }
  0x4e   : > { %s3963_s18 = scalar_lea.hbm %s4547_s12, %s3955_s9  ;;  %s3326_s5 = scalar_lea.hbm %s4547_s12, 1024 }
  0x4f   : > { %s3321_s28 = scalar_lea.hbm %s3963_s18, 512  ;;  %p3327_p10 = scmp.lt.u32.totalorder %s3963_s18, %s4547_s12 }
  0x50   : > { %p3322_p3 = scmp.ne.s32.totalorder %s3963_s18, %s3321_s28  ;;  %p3328_p11 = scmp.lt.u32.totalorder %s3326_s5, %s3321_s28 }
  0x51   : > { %s4549_s27 = scalar_select %p3978_p4, 1, 0 }
  0x52   : > { %p3324_p7 = pnand %p3978_p4, %p3322_p3  ;;  %p3329_p0 = por %p3328_p11, %p3327_p10 }
  0x53   : > { %p3330_p2 = scmp.lt.u32.totalorder %s3321_s28, %s3963_s18 }
  0x54   : > { %p3325_p9 = pneg %p3324_p7 }
  0x55   : > { %p3331_p5 = por %p3330_p2, %p3329_p0 }
  0x57   : > { %p3332_p13 = pnand %p3331_p5, %p3325_p9 }
  0x59   : > { %3335 = shalt.err (!%p3332_p13)
}
  0x5a   : > { %s3336_s29 = scalar_lea.vmem %s3970_s21, 512  ;;  %s3758_s23 = smov [#allocation19]  }
  0x5b   : > { %p3337_p3 = scmp.ne.s32.totalorder %s3970_s21, %s3336_s29  ;;  %s3341_s16 = sshll.u32 %s3758_s23, 4  ;;  %s3342_s16 = int_to_ptr.vmem [resolvable:$false] %s3341_s16 }
  0x5c   : > { %s3343_s15 = scalar_lea.vmem %s3342_s16, 1024  ;;  %p3344_p6 = scmp.lt.s32.totalorder %s3970_s21, %s3342_s16 }
  0x5d   : > { %p3339_p7 = pnand %p3337_p3, %p3978_p4  ;;  %p3345_p8 = scmp.lt.s32.totalorder %s3343_s15, %s3336_s29 }
  0x5f   : > { %p3340_p12 = pneg %p3339_p7  ;;  %p3346_p10 = por %p3345_p8, %p3344_p6 }
  0x61   : > { %p3347_p11 = pnand %p3346_p10, %p3340_p12 }
  0x63   : > { %3350 = shalt.err (!%p3347_p11)
}
  0x64   : > { %s4550_s5 = smov 8   ;;  %s4551_s28 = smov 128  }
  0x65   : > { %3213 = dma.hbm_to_vmem [thread:$0]  (!%p3965_p1), %s3963_s18, 512, %s3970_s21, %s3972_s17, %s4551_s28, %s4551_s28, %s4550_s5  }
  0x66   : > { %s3759_s20 = smov [#allocation5]   ;;  %s3760_s23 = smov [#allocation8]  }
  0x67   : > { %s420_s12 = sshll.u32 %s3759_s20, 4  ;;  %s446_s19 = sshll.u32 %s3760_s23, 4  ;;  %s421_s12 = int_to_ptr.vmem [resolvable:$true] %s420_s12  ;;  %s447_s19 = int_to_ptr.vmem [resolvable:$true] %s446_s19 }
  0x68   : > { %s4552_s1 = sld [smem:[#allocation43_spill]]  ;;  %p4553_p8 = scmp.ne.s32.totalorder %s4536_s22, 0 }
  0x6e   : > { %s3351_s15 = scalar_lea.hbm %s4552_s1, 256 }
  0x6f   : > { %p3352_p6 = scmp.ne.s32.totalorder %s4552_s1, %s3351_s15  ;;  %p3358_p5 = scmp.lt.u32.totalorder %s3351_s15, %s4552_s1 }
  0x71   : > { %p3354_p12 = pnand %p3352_p6, %p4553_p8 }
  0x73   : > { %p3355_p13 = pneg %p3354_p12 }
  0x75   : > { %p3360_p9 = pnand %p3358_p5, %p3355_p13 }
  0x77   : > { %3363 = shalt.err (!%p3360_p9)
}
  0x78   : > { %s3364_s18 = scalar_lea.vmem %s421_s12, 256  ;;  %p3372_p7 = scmp.lt.s32.totalorder %s421_s12, %s421_s12 }
  0x79   : > { %p3365_p0 = scmp.ne.s32.totalorder %s421_s12, %s3364_s18  ;;  %p3373_p10 = scmp.lt.s32.totalorder %s3364_s18, %s3364_s18 }
  0x7b   : > { %p3367_p2 = pnand %p3365_p0, %p4553_p8  ;;  %p3374_p11 = por %p3373_p10, %p3372_p7 }
  0x7d   : > { %p3368_p3 = pneg %p3367_p2 }
  0x7f   : > { %p3375_p1 = pnand %p3374_p11, %p3368_p3 }
  0x81   : > { %3378 = shalt.err (!%p3375_p1)
}
  0x82   : > { %p4554_p6 = scmp.ne.s32.totalorder %s4534_s26, 0  ;;  %s3379_s25 = scalar_lea.hbm %s4467_s3, 256 }
  0x83   : > { %p3380_p12 = scmp.ne.s32.totalorder %s4467_s3, %s3379_s25  ;;  %p3386_p5 = scmp.lt.u32.totalorder %s3379_s25, %s4467_s3 }
  0x84   : > { %3185 = dma.hbm_to_vmem [thread:$0]  (!%p4554_p6), %s4552_s1, 256, %s421_s12, [#allocation6], %s4551_s28, %s4551_s28, %s4550_s5  }
  0x85   : > { %p3382_p1 = pnand %p3380_p12, %p4553_p8 }
  0x87   : > { %p3383_p13 = pneg %p3382_p1 }
  0x89   : > { %p3388_p9 = pnand %p3386_p5, %p3383_p13 }
  0x8b   : > { %3391 = shalt.err (!%p3388_p9)
}
  0x8c   : > { %s3392_s15 = scalar_lea.vmem %s447_s19, 256  ;;  %p3400_p7 = scmp.lt.s32.totalorder %s447_s19, %s447_s19 }
  0x8d   : > { %p3393_p0 = scmp.ne.s32.totalorder %s447_s19, %s3392_s15  ;;  %p3401_p10 = scmp.lt.s32.totalorder %s3392_s15, %s3392_s15 }
  0x8f   : > { %p3395_p2 = pnand %p3393_p0, %p4553_p8  ;;  %p3402_p11 = por %p3401_p10, %p3400_p7 }
  0x91   : > { %p3396_p3 = pneg %p3395_p2 }
  0x93   : > { %p3403_p4 = pnand %p3402_p11, %p3396_p3 }
  0x95   : > { %3406 = shalt.err (!%p3403_p4)
}
  0x96   : > { %3191 = dma.hbm_to_vmem [thread:$0]  (!%p4554_p6), %s4467_s3, 256, %s447_s19, [#allocation9], %s4551_s28, %s4551_s28, %s4550_s5  }
  0x97   : > { %s3761_s11 = smov [#allocation11]   ;;  %s3762_s21 = smov [#allocation14]  }
  0x98   : > { %s475_s14 = sshll.u32 %s3761_s11, 4  ;;  %s501_s24 = sshll.u32 %s3762_s21, 4  ;;  %s476_s14 = int_to_ptr.vmem [resolvable:$true] %s475_s14  ;;  %s502_s24 = int_to_ptr.vmem [resolvable:$true] %s501_s24 }
  0x99   : > { %s3407_s23 = scalar_lea.hbm %s4470_s6, 256 }
  0x9a   : > { %p3408_p4 = scmp.ne.s32.totalorder %s4470_s6, %s3407_s23  ;;  %p3414_p13 = scmp.lt.u32.totalorder %s3407_s23, %s4470_s6 }
  0x9c   : > { %p3410_p12 = pnand %p3408_p4, %p4553_p8 }
  0x9e   : > { %p3411_p1 = pneg %p3410_p12 }
  0xa0   : > { %p3416_p5 = pnand %p3414_p13, %p3411_p1 }
  0xa2   : > { %3419 = shalt.err (!%p3416_p5)
}
  0xa3   : > { %s3420_s19 = scalar_lea.vmem %s476_s14, 256  ;;  %p3428_p3 = scmp.lt.s32.totalorder %s476_s14, %s476_s14 }
  0xa4   : > { %p3421_p9 = scmp.ne.s32.totalorder %s476_s14, %s3420_s19  ;;  %p3429_p7 = scmp.lt.s32.totalorder %s3420_s19, %s3420_s19 }
  0xa6   : > { %p3423_p0 = pnand %p3421_p9, %p4553_p8  ;;  %p3430_p10 = por %p3429_p7, %p3428_p3 }
  0xa8   : > { %p3424_p2 = pneg %p3423_p0 }
  0xaa   : > { %p3431_p11 = pnand %p3430_p10, %p3424_p2 }
  0xac   : > { %3434 = shalt.err (!%p3431_p11)
}
  0xad   : > { %3197 = dma.hbm_to_vmem [thread:$0]  (!%p4554_p6), %s4470_s6, 256, %s476_s14, [#allocation12], %s4551_s28, %s4551_s28, %s4550_s5  }
  0xae   : > { %s3435_s20 = scalar_lea.hbm %s4472_s8, 256 }
  0xaf   : > { %p3436_p4 = scmp.ne.s32.totalorder %s4472_s8, %s3435_s20  ;;  %p3442_p13 = scmp.lt.u32.totalorder %s3435_s20, %s4472_s8 }
  0xb1   : > { %p3438_p12 = pnand %p3436_p4, %p4553_p8 }
  0xb3   : > { %p3439_p1 = pneg %p3438_p12 }
  0xb5   : > { %p3444_p5 = pnand %p3442_p13, %p3439_p1 }
  0xb7   : > { %3447 = shalt.err (!%p3444_p5)
}
  0xb8   : > { %s3448_s12 = scalar_lea.vmem %s502_s24, 256  ;;  %p3456_p3 = scmp.lt.s32.totalorder %s502_s24, %s502_s24 }
  0xb9   : > { %p3449_p9 = scmp.ne.s32.totalorder %s502_s24, %s3448_s12  ;;  %p3457_p7 = scmp.lt.s32.totalorder %s3448_s12, %s3448_s12 }
  0xbb   : > { %p3451_p0 = pnand %p3449_p9, %p4553_p8  ;;  %p3458_p10 = por %p3457_p7, %p3456_p3 }
  0xbd   : > { %p3452_p2 = pneg %p3451_p0 }
  0xbf   : > { %p3459_p11 = pnand %p3458_p10, %p3452_p2 }
  0xc1   : > { %3462 = shalt.err (!%p3459_p11)
}
  0xc2   : > { %3203 = dma.hbm_to_vmem [thread:$0]  (!%p4554_p6), %s4472_s8, 256, %s502_s24, [#allocation15], %s4551_s28, %s4551_s28, %s4550_s5  }
  0xc3   : > { %s4093_s21 = scalar_lea.hbm %s4477_s13, %s3955_s9  ;;  %s569_s25 = scalar_lea.vmem [#allocation20], %s3957_s0 }
  0xc4   : > { %s576_s20 = sshll.u32 %s569_s25, 4  ;;  %s3463_s23 = scalar_lea.hbm %s4093_s21, 512  ;;  %s4096_s20 = int_to_ptr.vmem [resolvable:$true] %s576_s20 }
  0xc5   : > { %p3464_p4 = scmp.ne.s32.totalorder %s4093_s21, %s3463_s23  ;;  %p4555_p12 = scmp.ne.s32.totalorder %s4549_s27, 0 }
  0xc6   : > { %s3468_s29 = scalar_lea.hbm %s4477_s13, 1024  ;;  %p3469_p5 = scmp.lt.u32.totalorder %s4093_s21, %s4477_s13 }
  0xc7   : > { %p3466_p1 = pnand %p3464_p4, %p4555_p12  ;;  %p3470_p9 = scmp.lt.u32.totalorder %s3468_s29, %s3463_s23 }
  0xc8   : > { %p3472_p2 = scmp.lt.u32.totalorder %s3463_s23, %s4093_s21 }
  0xc9   : > { %p3467_p13 = pneg %p3466_p1  ;;  %p3471_p0 = por %p3470_p9, %p3469_p5 }
  0xcb   : > { %p3473_p3 = por %p3472_p2, %p3471_p0 }
  0xcd   : > { %p3474_p7 = pnand %p3473_p3, %p3467_p13 }
  0xcf   : > { %3477 = shalt.err (!%p3474_p7)
}
  0xd0   : > { %s3478_s14 = scalar_lea.vmem %s4096_s20, 512  ;;  %s3763_s19 = smov [#allocation20]  }
  0xd1   : > { %p3479_p10 = scmp.ne.s32.totalorder %s4096_s20, %s3478_s14  ;;  %s3483_s18 = sshll.u32 %s3763_s19, 4  ;;  %s3484_s18 = int_to_ptr.vmem [resolvable:$false] %s3483_s18 }
  0xd2   : > { %s3485_s11 = scalar_lea.vmem %s3484_s18, 1024  ;;  %p3486_p1 = scmp.lt.s32.totalorder %s4096_s20, %s3484_s18 }
  0xd3   : > { %p3481_p11 = pnand %p3479_p10, %p4555_p12  ;;  %p3487_p6 = scmp.lt.s32.totalorder %s3485_s11, %s3478_s14 }
  0xd5   : > { %p3482_p4 = pneg %p3481_p11  ;;  %p3488_p5 = por %p3487_p6, %p3486_p1 }
  0xd7   : > { %p3489_p9 = pnand %p3488_p5, %p3482_p4 }
  0xd9   : > { %3492 = shalt.err (!%p3489_p9)
}
  0xda   : > { %p4556_p13 = scmp.ne.s32.totalorder %s4548_s30, 0  ;;  %s3764_s25 = smov [#allocation7]  }
  0xdb   : > { %s433_s23 = sshll.u32 %s3764_s25, 4  ;;  %s3765_s16 = smov [#allocation10]   ;;  %s434_s23 = int_to_ptr.vmem [resolvable:$true] %s433_s23 }
  0xdc   : > { %3216 = dma.hbm_to_vmem [thread:$0]  (!%p4556_p13), %s4093_s21, 512, %s4096_s20, %s3972_s17, %s4551_s28, %s4551_s28, %s4550_s5  }
  0xdd   : > { %s459_s24 = sshll.u32 %s3765_s16, 4  ;;  %s4557_s2 = sld [smem:[#allocation44_spill]]  ;;  %s460_s24 = int_to_ptr.vmem [resolvable:$true] %s459_s24 }
  0xe3   : > { %s3493_s12 = scalar_lea.hbm %s4557_s2, 256 }
  0xe4   : > { %p3494_p6 = scmp.ne.s32.totalorder %s4557_s2, %s3493_s12  ;;  %p3500_p3 = scmp.lt.u32.totalorder %s3493_s12, %s4557_s2 }
  0xe6   : > { %p3496_p0 = pnand %p3494_p6, %p4553_p8 }
  0xe8   : > { %p3497_p2 = pneg %p3496_p0 }
  0xea   : > { %p3502_p7 = pnand %p3500_p3, %p3497_p2 }
  0xec   : > { %3505 = shalt.err (!%p3502_p7)
}
  0xed   : > { %s3506_s21 = scalar_lea.vmem %s434_s23, 256  ;;  %p3514_p1 = scmp.lt.s32.totalorder %s434_s23, %s434_s23 }
  0xee   : > { %p3507_p10 = scmp.ne.s32.totalorder %s434_s23, %s3506_s21  ;;  %p3515_p5 = scmp.lt.s32.totalorder %s3506_s21, %s3506_s21 }
  0xf0   : > { %p3509_p11 = pnand %p3507_p10, %p4553_p8  ;;  %p3516_p9 = por %p3515_p5, %p3514_p1 }
  0xf2   : > { %p3510_p4 = pneg %p3509_p11 }
  0xf4   : > { %p3517_p13 = pnand %p3516_p9, %p3510_p4 }
  0xf6   : > { %3520 = shalt.err (!%p3517_p13)
}
  0xf7   : > { %p4558_p6 = scmp.ne.s32.totalorder %s4534_s26, 0  ;;  %s3521_s15 = scalar_lea.hbm %s4468_s4, 256 }
  0xf8   : > { %p3522_p0 = scmp.ne.s32.totalorder %s4468_s4, %s3521_s15  ;;  %p3528_p3 = scmp.lt.u32.totalorder %s3521_s15, %s4468_s4 }
  0xf9   : > { %3188 = dma.hbm_to_vmem [thread:$0]  (!%p4558_p6), %s4557_s2, 256, %s434_s23, [#allocation6], %s4551_s28, %s4551_s28, %s4550_s5  }
  0xfa   : > { %p3524_p13 = pnand %p3522_p0, %p4553_p8 }
  0xfc   : > { %p3525_p2 = pneg %p3524_p13 }
  0xfe   : > { %p3530_p7 = pnand %p3528_p3, %p3525_p2 }
 0x100   : > { %3533 = shalt.err (!%p3530_p7)
}
 0x101   : > { %s3534_s11 = scalar_lea.vmem %s460_s24, 256  ;;  %p3542_p1 = scmp.lt.s32.totalorder %s460_s24, %s460_s24 }
 0x102   : > { %p3535_p10 = scmp.ne.s32.totalorder %s460_s24, %s3534_s11  ;;  %p3543_p5 = scmp.lt.s32.totalorder %s3534_s11, %s3534_s11 }
 0x104   : > { %p3537_p11 = pnand %p3535_p10, %p4553_p8  ;;  %p3544_p9 = por %p3543_p5, %p3542_p1 }
 0x106   : > { %p3538_p4 = pneg %p3537_p11 }
 0x108   : > { %p3545_p12 = pnand %p3544_p9, %p3538_p4 }
 0x10a   : > { %3548 = shalt.err (!%p3545_p12)
}
 0x10b   : > { %3194 = dma.hbm_to_vmem [thread:$0]  (!%p4558_p6), %s4468_s4, 256, %s460_s24, [#allocation9], %s4551_s28, %s4551_s28, %s4550_s5  }
 0x10c   : > { %s3766_s20 = smov [#allocation13]   ;;  %s3767_s16 = smov [#allocation16]  }
 0x10d   : > { %s488_s25 = sshll.u32 %s3766_s20, 4  ;;  %s517_s29 = sshll.u32 %s3767_s16, 4  ;;  %s489_s25 = int_to_ptr.vmem [resolvable:$true] %s488_s25  ;;  %s518_s29 = int_to_ptr.vmem [resolvable:$true] %s517_s29 }
 0x10e   : > { %s3549_s14 = scalar_lea.hbm %s4471_s7, 256 }
 0x10f   : > { %p3550_p12 = scmp.ne.s32.totalorder %s4471_s7, %s3549_s14  ;;  %p3556_p2 = scmp.lt.u32.totalorder %s3549_s14, %s4471_s7 }
 0x111   : > { %p3552_p0 = pnand %p3550_p12, %p4553_p8 }
 0x113   : > { %p3553_p13 = pneg %p3552_p0 }
 0x115   : > { %p3558_p3 = pnand %p3556_p2, %p3553_p13 }
 0x117   : > { %3561 = shalt.err (!%p3558_p3)
}
 0x118   : > { %s3562_s24 = scalar_lea.vmem %s489_s25, 256  ;;  %p3570_p4 = scmp.lt.s32.totalorder %s489_s25, %s489_s25 }
 0x119   : > { %p3563_p7 = scmp.ne.s32.totalorder %s489_s25, %s3562_s24  ;;  %p3571_p1 = scmp.lt.s32.totalorder %s3562_s24, %s3562_s24 }
 0x11b   : > { %p3565_p10 = pnand %p3563_p7, %p4553_p8  ;;  %p3572_p5 = por %p3571_p1, %p3570_p4 }
 0x11d   : > { %p3566_p11 = pneg %p3565_p10 }
 0x11f   : > { %p3573_p9 = pnand %p3572_p5, %p3566_p11 }
 0x121   : > { %3576 = shalt.err (!%p3573_p9)
}
 0x122   : > { %3200 = dma.hbm_to_vmem [thread:$0]  (!%p4558_p6), %s4471_s7, 256, %s489_s25, [#allocation12], %s4551_s28, %s4551_s28, %s4550_s5  }
 0x123   : > { %s3577_s12 = scalar_lea.hbm %s4474_s10, 256 }
 0x124   : > { %p3578_p12 = scmp.ne.s32.totalorder %s4474_s10, %s3577_s12  ;;  %p3584_p2 = scmp.lt.u32.totalorder %s3577_s12, %s4474_s10 }
 0x126   : > { %p3580_p0 = pnand %p3578_p12, %p4553_p8 }
 0x128   : > { %p3581_p13 = pneg %p3580_p0 }
 0x12a   : > { %p3586_p3 = pnand %p3584_p2, %p3581_p13 }
 0x12c   : > { %3589 = shalt.err (!%p3586_p3)
}
 0x12d   : > { %s3590_s23 = scalar_lea.vmem %s518_s29, 256  ;;  %p3598_p4 = scmp.lt.s32.totalorder %s518_s29, %s518_s29 }
 0x12e   : > { %p3591_p7 = scmp.ne.s32.totalorder %s518_s29, %s3590_s23  ;;  %p3599_p1 = scmp.lt.s32.totalorder %s3590_s23, %s3590_s23 }
 0x130   : > { %p3593_p10 = pnand %p3591_p7, %p4553_p8  ;;  %p3600_p5 = por %p3599_p1, %p3598_p4 }
 0x132   : > { %p3594_p11 = pneg %p3593_p10 }
 0x134   : > { %p3601_p9 = pnand %p3600_p5, %p3594_p11 }
 0x136   : > { %3604 = shalt.err (!%p3601_p9)
}
 0x137   : > { %3206 = dma.hbm_to_vmem [thread:$0]  (!%p4558_p6), %s4474_s10, 256, %s518_s29, [#allocation15], %s4551_s28, %s4551_s28, %s4550_s5  }
 0x138   : > { %s3768_s21 = smov [#allocation17]   ;;  %s4559_s12 = sld [smem:[#allocation49_spill]] }
 0x139   : > { %s530_s20 = sshll.u32 %s3768_s21, 4  ;;  %s4560_s11 = sld [smem:[#allocation47_spill]]  ;;  %s531_s20 = int_to_ptr.vmem [resolvable:$true] %s530_s20 }
 0x13e   : > { %s4211_s14 = scalar_lea.hbm %s4559_s12, %s3955_s9 }
 0x13f   : > { %s3605_s23 = scalar_lea.hbm %s4560_s11, 256 }
 0x140   : > { %p3606_p12 = scmp.ne.s32.totalorder %s4560_s11, %s3605_s23  ;;  %p3612_p2 = scmp.lt.u32.totalorder %s3605_s23, %s4560_s11 }
 0x142   : > { %p3608_p0 = pnand %p3606_p12, %p4553_p8 }
 0x144   : > { %p3609_p13 = pneg %p3608_p0 }
 0x146   : > { %p3614_p3 = pnand %p3612_p2, %p3609_p13 }
 0x148   : > { %3617 = shalt.err (!%p3614_p3)
}
 0x149   : > { %s3618_s24 = scalar_lea.vmem %s531_s20, 256  ;;  %p3626_p4 = scmp.lt.s32.totalorder %s531_s20, %s531_s20 }
 0x14a   : > { %p3619_p7 = scmp.ne.s32.totalorder %s531_s20, %s3618_s24  ;;  %p3627_p1 = scmp.lt.s32.totalorder %s3618_s24, %s3618_s24 }
 0x14c   : > { %p3621_p10 = pnand %p3619_p7, %p4553_p8  ;;  %p3628_p5 = por %p3627_p1, %p3626_p4 }
 0x14e   : > { %p3622_p11 = pneg %p3621_p10 }
 0x150   : > { %p3629_p9 = pnand %p3628_p5, %p3622_p11 }
 0x152   : > { %3632 = shalt.err (!%p3629_p9)
}
 0x153   : > { %3209 = dma.hbm_to_vmem [thread:$0]  (!%p4558_p6), %s4560_s11, 256, %s531_s20, [#allocation18], %s4551_s28, %s4551_s28, %s4550_s5  }
 0x154   : > { %s590_s22 = scalar_lea.vmem [#allocation21], %s3957_s0  ;;  %s3633_s21 = scalar_lea.hbm %s4211_s14, 512 }
 0x155   : > { %s597_s9 = sshll.u32 %s590_s22, 4  ;;  %p3634_p8 = scmp.ne.s32.totalorder %s4211_s14, %s3633_s21  ;;  %s4235_s9 = int_to_ptr.vmem [resolvable:$true] %s597_s9 }
 0x156   : > { %p4561_p12 = scmp.ne.s32.totalorder %s4549_s27, 0  ;;  %s3638_s15 = scalar_lea.hbm %s4559_s12, 1024 }
 0x157   : > { %p3639_p2 = scmp.lt.u32.totalorder %s4211_s14, %s4559_s12  ;;  %p3640_p3 = scmp.lt.u32.totalorder %s3638_s15, %s3633_s21 }
 0x158   : > { %p3636_p0 = pnand %p3634_p8, %p4561_p12  ;;  %p3642_p6 = scmp.lt.u32.totalorder %s3633_s21, %s4211_s14 }
 0x159   : > { %p3641_p7 = por %p3640_p3, %p3639_p2 }
 0x15a   : > { %p3637_p13 = pneg %p3636_p0 }
 0x15b   : > { %p3643_p10 = por %p3642_p6, %p3641_p7 }
 0x15d   : > { %p3644_p11 = pnand %p3643_p10, %p3637_p13 }
 0x15f   : > { %3647 = shalt.err (!%p3644_p11)
}
 0x160   : > { %s3648_s0 = scalar_lea.vmem %s4235_s9, 512  ;;  %s3769_s20 = smov [#allocation21]  }
 0x161   : > { %p3649_p4 = scmp.ne.s32.totalorder %s4235_s9, %s3648_s0  ;;  %s3653_s23 = sshll.u32 %s3769_s20, 4  ;;  %s3654_s23 = int_to_ptr.vmem [resolvable:$false] %s3653_s23 }
 0x162   : > { %s3655_s29 = scalar_lea.vmem %s3654_s23, 1024  ;;  %p3656_p9 = scmp.lt.s32.totalorder %s4235_s9, %s3654_s23 }
 0x163   : > { %p3651_p1 = pnand %p3649_p4, %p4561_p12  ;;  %p3657_p8 = scmp.lt.s32.totalorder %s3655_s29, %s3648_s0 }
 0x165   : > { %p3652_p5 = pneg %p3651_p1  ;;  %p3658_p0 = por %p3657_p8, %p3656_p9 }
 0x167   : > { %p3659_p2 = pnand %p3658_p0, %p3652_p5 }
 0x169   : > { %3662 = shalt.err (!%p3659_p2)
}
 0x16a   : > { %p4562_p13 = scmp.ne.s32.totalorder %s4548_s30, 0  ;;  %s4563_s27 = sld [smem:[#allocation36_spill]] }
 0x16c   : > { %3219 = dma.hbm_to_vmem [thread:$0]  (!%p4562_p13), %s4211_s14, 512, %s4235_s9, %s3972_s17, %s4551_s28, %s4551_s28, %s4550_s5  }
 0x170   : > { %p4564_p12 = scmp.ne.s32.totalorder %s4563_s27, 0 }
 0x171   : > { %s4565_s25 = sld [smem:[#allocation35_spill]] (!%p4564_p12) }
 0x172   : > { %609 = sbr.rel (%p4564_p12) target bundleno = 1930 (0x78a), region = 80 }
 0x177   : > { %p4566_p3 = scmp.eq.s32.totalorder (!%p4564_p12), %s4565_s25, 0 }
 0x179   : > { %3708 = dma.done.wait (%p4566_p3), [#allocation3], 256   ;;  %p4567_p7 = pmov %p4566_p3 }
 0x17a   : > { %p4568_p6 = pmov %p4566_p3 }
 0x17b   : > { %3710 = vsyncadd (%p4567_p7), [#allocation3], 4294967040 }
 0x17c   : > { %3712 = dma.done.wait (%p4568_p6), [#allocation6], 512   ;;  %p4569_p10 = pmov %p4566_p3 }
 0x17d   : > { %p4570_p11 = pmov %p4566_p3 }
 0x17e   : > { %3714 = vsyncadd (%p4569_p10), [#allocation6], 4294966784 }
 0x17f   : > { %3716 = dma.done.wait (%p4570_p11), [#allocation9], 512   ;;  %p4571_p4 = pmov %p4566_p3 }
 0x180   : > { %p4572_p1 = pmov %p4566_p3 }
 0x181   : > { %3718 = vsyncadd (%p4571_p4), [#allocation9], 4294966784 }
 0x182   : > { %3720 = dma.done.wait (%p4572_p1), [#allocation12], 512   ;;  %p4573_p5 = pmov %p4572_p1 }
 0x183   : > { %p4574_p9 = pmov %p4572_p1 }
 0x184   : > { %3722 = vsyncadd (%p4573_p5), [#allocation12], 4294966784 }
 0x185   : > { %3724 = dma.done.wait (%p4574_p9), [#allocation15], 512   ;;  %p4575_p8 = pmov %p4572_p1 }
 0x186   : > { %p4576_p0 = pmov %p4572_p1 }
 0x187   : > { %3726 = vsyncadd (%p4575_p8), [#allocation15], 4294966784 }
 0x188   : > { %3728 = dma.done.wait (%p4576_p0), [#allocation18], 256   ;;  %p4577_p2 = pmov %p4576_p0 }
 0x189   : > { %s4578_s30 = sld [smem:[#allocation32_spill]]  ;;  %s651_s5 = sand.u32 1, %s4565_s25  }
 0x18a   : > { %3730 = vsyncadd (%p4577_p2), [#allocation18], 4294967040  ;;  %s4579_s17 = sld [smem:[#allocation39_spill]]  ;;  %s652_s24 = scalar_lea.sflag [#allocation3], %s651_s5 }
 0x18f   : > { %s653_s28 = sand.u32 1, %s4578_s30  }
 0x190   : > { %s4292_s14 = sshll.u32 %s653_s28, 5  ;;  %p4580_p13 = scmp.ne.s32.totalorder %s4579_s17, 0 }
 0x191   : > { %s4295_s1 = scalar_lea.vmem [#allocation19], %s4292_s14 }
 0x192   : > { %3732 = dma.done.wait (%p4580_p13), %s652_s24, 1536  }
 0x193   : > { %3734 = vsyncadd (%p4580_p13), %s652_s24, 4294965760  ;;  %vm737_vm0 = vcmask 130048   ;;  %v735_v0 = vld [vmem:[#allocation2] sm:$0xff]  ;;  %v736_v1 = vld [vmem:[#allocation2 + $0x8] sm:$0xff]  ;;  %s664_s2 = scalar_lea.vmem [#allocation20], %s4292_s14  ;;  %s4581_s21 = sld [smem:[#allocation45_spill]] }
 0x194   : > { %v819_v2 = vld [vmem:[#allocation5] sm:$0xff]  ;;  %v4301_v3 = vpack.c.bf16 %v736_v1, %v735_v0  ;;  %v820_v4 = vld [vmem:[#allocation5 + $0x8] sm:$0xff]  ;;  %v730_v5 = vld [vmem:[%s664_s2] sm:$0xff]  ;;  %s673_s19 = scalar_lea.vmem [#allocation21], %s4292_s14  ;;  %s4583_s20 = sld [smem:[#allocation46_spill]] }
 0x195   : > { %v2808_v6 = vld [vmem:[%s664_s2 + $0x10] sm:$0xff]  ;;  %v4304_v7 = vpack.c.bf16 %v820_v4, %v819_v2  ;;  %2937 = vmatprep.mubr.msk.f32.mxu0 %vm737_vm0, %v730_v5  ;;  %v904_v8 = vld [vmem:[#allocation7] sm:$0xff]  ;;  %v905_v9 = vld [vmem:[#allocation7 + $0x8] sm:$0xff]  ;;  %s729_s17 = scalar_lea.vmem [#allocation22], %s4292_s14  ;;  %s4585_s24 = sld [smem:[#allocation40_spill]] }
 0x196   : > { %2944 = vmatprep.mubr.msk.f32.mxu1 %vm737_vm0, %v2808_v6  ;;  %3060 = vmatprep.subr.bf16.mxu0 %v4301_v3  ;;  %v731_v10 = vld [vmem:[%s664_s2 + $0x8] sm:$0xff]  ;;  %v4311_v11 = vpack.c.bf16 %v905_v9, %v904_v8  ;;  %v902_v12 = vadd.f32 %v2808_v6, %v730_v5  ;;  %v2809_v13 = vld [vmem:[%s664_s2 + $0x18] sm:$0xff]  ;;  %v1057_v24 = vld [vmem:[#allocation8] sm:$0xff]  ;;  %s2563_s5 = sshll.u32 %s729_s17, 4  ;;  %s4586_s22 = sld [smem:[#allocation50_spill]]  ;;  %s4410_s5 = int_to_ptr.vmem [resolvable:$true] %s2563_s5 }
 0x197   : > { %3064 = vmatprep.subr.bf16.mxu1 %v4304_v7  ;;  %3062 = vmatpush3.bf16.msra.mxu0 %v4301_v3  ;;  %v903_v14 = vadd.f32 %v2809_v13, %v731_v10  ;;  %v1058_v25 = vld [vmem:[#allocation8 + $0x8] sm:$0xff]  ;;  %v1140_v30 = vld [vmem:[#allocation10] sm:$0xff]  ;;  %v1141_v31 = vld [vmem:[#allocation10 + $0x8] sm:$0xff]  ;;  %s3770_s16 = smov [#allocation22]  }
 0x198   : > { %3066 = vmatpush3.bf16.msra.mxu1 %v4304_v7  ;;  %3068 = vmatprep.subr.bf16.mxu0 %v4311_v11  ;;  %v3071_v27 = vpack.c.bf16 %v1058_v25, %v1057_v24  ;;  %v3075_v32 = vpack.c.bf16 %v1141_v31, %v1140_v30  ;;  %v1314_v40 = vld [vmem:[%s673_s19] sm:$0xff]  ;;  %v2822_v41 = vld [vmem:[%s673_s19 + $0x10] sm:$0xff]  ;;  %v1315_v44 = vld [vmem:[%s673_s19 + $0x8] sm:$0xff]  ;;  %s3667_s15 = sshll.u32 %s3770_s16, 4  ;;  %s3668_s15 = int_to_ptr.vmem [resolvable:$false] %s3667_s15 }
 0x199   : > { %s4582_s26 = smov %s4581_s21  ;;  %v1225_v33 = vld [vmem:[%s4581_s21] sm:$0xff]  ;;  %v1481_v45 = vadd.f32 %v2822_v41, %v1314_v40  ;;  %v2823_v46 = vld [vmem:[%s673_s19 + $0x18] sm:$0xff]  ;;  %v2836_v9 = vld [vmem:[%s4295_s1 + $0x10] sm:$0xff]  ;;  %s3663_s21 = scalar_lea.vmem %s4410_s5, 512 }
 0x19a   : > { %2938 = vmatmul.mubr.msk.f32.vlgmr.msra.gmra.mrb[0].mxu0 %vm737_vm0, %v731_v10  ;;  %3072 = vmatprep.subr.bf16.mxu1 %v3071_v27  ;;  %v1226_v34 = vld [vmem:[%s4582_s26 + $0x8] sm:$0xff]  ;;  %v1482_v47 = vadd.f32 %v2823_v46, %v1315_v44  ;;  %v1885_v8 = vld [vmem:[%s4295_s1] sm:$0xff]  ;;  %v2134_v24 = vld [vmem:[#allocation14] sm:$0xff]  ;;  %s4584_s23 = smov %s4583_s20  ;;  %p3664_p12 = scmp.ne.s32.totalorder %s4410_s5, %s3663_s21 }
 0x19b   : > { %2945 = vmatmul.mubr.msk.f32.vlgmr.msra.gmra.mrb[0].mxu1 %vm737_vm0, %v2809_v13  ;;  %3070 = vmatpush3.bf16.msra.mxu0 %v4311_v11  ;;  %v4326_v35 = vpack.c.bf16 %v1226_v34, %v1225_v33  ;;  %v1886_v10 = vld [vmem:[%s4295_s1 + $0x8] sm:$0xff]  ;;  %v2135_v25 = vld [vmem:[#allocation14 + $0x8] sm:$0xff]  ;;  %p4587_p3 = scmp.ne.s32.totalorder %s4585_s24, 0  ;;  %s3669_s19 = scalar_lea.vmem %s3668_s15, 1024 }
 0x19c   : > { %2951 = vmatprep.mubr.msk.f32.mxu0 %vm737_vm0, %v902_v12  ;;  %3074 = vmatpush3.bf16.msra.mxu1 %v3071_v27  ;;  %p3670_p10 = scmp.lt.s32.totalorder %s4410_s5, %s3668_s15  ;;  %p3671_p11 = scmp.lt.s32.totalorder %s3669_s19, %s3663_s21 }
 0x19d   : > { %3076 = vmatprep.subr.bf16.mxu0 %v3075_v32  ;;  %3080 = vmatprep.subr.bf16.mxu1 %v4326_v35  ;;  %p3665_p7 = pnand %p3664_p12, %p4587_p3 }
 0x19e   : > { %2952 = vmatmul.mubr.msk.f32.vlgmr.msra.gmra.mrb[2].mxu0 %vm737_vm0, %v903_v14  ;;  %p3672_p4 = por %p3671_p11, %p3670_p10 }
 0x19f   : > { %3078 = vmatpush3.bf16.msra.mxu0 %v3075_v32  ;;  %p3666_p6 = pneg %p3665_p7 }
 0x1a0   : > { %3084 = vmatprep.subr.bf16.mxu0 %v4301_v3 }
 0x1a1   : > { %p3673_p1 = pnand %p3672_p4, %p3666_p6 }
 0x26d   : > { %v2939_v15 = vpop.f32.mrb[0].mxu0 }
 0x26e   : > { %v2946_v16 = vpop.f32.mrb[0].mxu1  ;;  %v810_v17 = vpop.f32.mrb[1].mxu0 }
 0x26f   : > { %v893_v18 = vpop.f32.mrb[1].mxu1  ;;  %v988_v19 = vsub.f32 %v2939_v15, %v2946_v16 }
 0x270   : > { %v987_v20 = vsub.f32 %v810_v17, %v893_v18 }
 0x271   : > { %v2953_v21 = vpop.f32.mrb[2].mxu0 }
 0x272   : > { %993 = vxpose.xlu0.b32.start [1/2] (short) (narrow) %v987_v20, 16  ;;  %v990_v22 = vsub.f32 %v2953_v21, %v2939_v15  ;;  %v978_v23 = vpop.f32.mrb[3].mxu0  ;;  %v2049_v21 = vld [vmem:[#allocation13] sm:$0xff] }
 0x273   : > { %v989_v26 = vsub.f32 %v978_v23, %v810_v17 }
 0x274   : > { %v992_v28 = vsub.f32 %v990_v22, %v2946_v16  ;;  %v2050_v22 = vld [vmem:[#allocation13 + $0x8] sm:$0xff] }
 0x275   : > { %v991_v29 = vsub.f32 %v989_v26, %v893_v18  ;;  %v1966_v18 = vld [vmem:[#allocation11] sm:$0xff]  ;;  %v3111_v23 = vpack.c.bf16 %v2050_v22, %v2049_v21  ;;  %v3115_v26 = vpack.c.bf16 %v2135_v25, %v2134_v24 }
 0x276   : > { %994 = vxpose.xlu0.b32.end [2/2] (short) (narrow) %v988_v19, 16  ;;  %v1967_v19 = vld [vmem:[#allocation11 + $0x8] sm:$0xff] }
 0x277   : > { %1025 = vxpose.xlu1.b32.start [1/2] (short) (narrow) %v991_v29, 16  ;;  %v3107_v20 = vpack.c.bf16 %v1967_v19, %v1966_v18 }
 0x27b   : > { %1026 = vxpose.xlu1.b32.end [2/2] (short) (narrow) %v992_v28, 16 }
 0x2f2   : > { %v1009_v36 = vpop.trf.xlu0 }
 0x2f3   : > { %2958 = vmatprep.mubr.msk.f32.mxu1 %vm737_vm0, %v1009_v36 }
 0x2f6   : > { %v1010_v37 = vpop.trf.xlu0 }
 0x2f7   : > { %v1041_v38 = vpop.trf.xlu1  ;;  %2959 = vmatmul.mubr.msk.f32.vlgmr.msra.gmra.mrb[2].mxu1 %vm737_vm0, %v1010_v37 }
 0x2f8   : > { %v1223_v39 = vadd.f32 %v1041_v38, %v1009_v36  ;;  %2965 = vmatprep.mubr.msk.f32.mxu0 %vm737_vm0, %v1041_v38  ;;  %3082 = vmatpush3.bf16.msra.mxu1 %v4326_v35 }
 0x2f9   : > { %3088 = vmatprep.subr.bf16.mxu1 %v4304_v7 }
 0x2fa   : > { %2972 = vmatprep.mubr.msk.f32.mxu1 %vm737_vm0, %v1223_v39 }
 0x2fb   : > { %v1042_v42 = vpop.trf.xlu1 }
 0x2fc   : > { %v1224_v43 = vadd.f32 %v1042_v42, %v1010_v37  ;;  %2966 = vmatmul.mubr.msk.f32.vlgmr.msra.gmra.mrb[4].mxu0 %vm737_vm0, %v1042_v42 }
 0x2fd   : > { %3086 = vmatpush3.bf16.msra.mxu0 %v4301_v3  ;;  %2979 = vmatprep.mubr.msk.f32.mxu0 %vm737_vm0, %v1314_v40 }
 0x2fe   : > { %2973 = vmatmul.mubr.msk.f32.vlgmr.msra.gmra.mrb[4].mxu1 %vm737_vm0, %v1224_v43  ;;  %3092 = vmatprep.subr.bf16.mxu0 %v4311_v11 }
 0x2ff   : > { %3090 = vmatpush3.bf16.msra.mxu1 %v4304_v7  ;;  %2986 = vmatprep.mubr.msk.f32.mxu1 %vm737_vm0, %v2822_v41 }
 0x300   : > { %2980 = vmatmul.mubr.msk.f32.vlgmr.msra.gmra.mrb[6].mxu0 %vm737_vm0, %v1315_v44  ;;  %3096 = vmatprep.subr.bf16.mxu1 %v3071_v27 }
 0x301   : > { %3094 = vmatpush3.bf16.msra.mxu0 %v4311_v11  ;;  %2993 = vmatprep.mubr.msk.f32.mxu0 %vm737_vm0, %v1481_v45  ;;  %v2837_v11 = vld [vmem:[%s4295_s1 + $0x18] sm:$0xff]  ;;  %s2860_s1 = sshll.u32 %s4565_s25, 9  ;;  %s4422_s25 = scalar_lea.sflag [#allocation4], %s653_s28 }
 0x302   : > { %2987 = vmatmul.mubr.msk.f32.vlgmr.msra.gmra.mrb[6].mxu1 %vm737_vm0, %v2823_v46  ;;  %3100 = vmatprep.subr.bf16.mxu0 %v3075_v32  ;;  %s4416_s9 = scalar_lea.hbm %s4586_s22, %s2860_s1 }
 0x303   : > { %3098 = vmatpush3.bf16.msra.mxu1 %v3071_v27 }
 0x304   : > { %2994 = vmatmul.mubr.msk.f32.vlgmr.msra.gmra.mrb[8].mxu0 %vm737_vm0, %v1482_v47  ;;  %3104 = vmatprep.subr.bf16.mxu1 %v4326_v35 }
 0x305   : > { %3102 = vmatpush3.bf16.msra.mxu0 %v3075_v32 }
 0x306   : > { %3108 = vmatprep.subr.bf16.mxu0 %v3107_v20 }
 0x3ca   : > { %v4350_v48 = vpop.f32.mrb[2].mxu1 }
 0x3cb   : > { %v4352_v49 = vpop.f32.mrb[3].mxu1 }
 0x3cf   : > { %v4354_v50 = vpop.f32.mrb[4].mxu0 }
 0x3d0   : > { %v1309_v51 = vsub.f32 %v4350_v48, %v4354_v50  ;;  %v4358_v52 = vpop.f32.mrb[5].mxu0 }
 0x3d1   : > { %v1308_v53 = vsub.f32 %v4352_v49, %v4358_v52  ;;  %v2974_v54 = vpop.f32.mrb[4].mxu1 }
 0x3d2   : > { %v1311_v55 = vsub.f32 %v2974_v54, %v4350_v48  ;;  %v1299_v56 = vpop.f32.mrb[5].mxu1 }
 0x3d3   : > { %v1310_v57 = vsub.f32 %v1299_v56, %v4352_v49  ;;  %v2981_v58 = vpop.f32.mrb[6].mxu0 }
 0x3d4   : > { %v4365_v59 = vsub.f32 %v1311_v55, %v4354_v50  ;;  %v1391_v60 = vpop.f32.mrb[7].mxu0 }
 0x3d5   : > { %v4368_v61 = vsub.f32 %v1310_v57, %v4358_v52  ;;  %v2988_v62 = vpop.f32.mrb[6].mxu1 }
 0x3d6   : > { %v1565_v63 = vsub.f32 %v2981_v58, %v2988_v62  ;;  %v1472_v0 = vpop.f32.mrb[7].mxu1 }
 0x3d7   : > { %v2995_v1 = vpop.f32.mrb[8].mxu0  ;;  %v1564_v2 = vsub.f32 %v1391_v60, %v1472_v0 }
 0x3d8   : > { %v1567_v3 = vsub.f32 %v2995_v1, %v2981_v58  ;;  %v1555_v4 = vpop.f32.mrb[9].mxu0 }
 0x3d9   : > { %v1566_v5 = vsub.f32 %v1555_v4, %v1391_v60  ;;  %1570 = vxpose.xlu0.b32.start [1/2] (short) (narrow) %v1564_v2, 16  ;;  %v2288_v4 = vld [vmem:[%s4584_s23 + $0x8] sm:$0xff] }
 0x3da   : > { %v1569_v6 = vsub.f32 %v1567_v3, %v2988_v62  ;;  %v2287_v3 = vld [vmem:[%s4583_s20] sm:$0xff] }
 0x3db   : > { %v1568_v7 = vsub.f32 %v1566_v5, %v1472_v0 }
 0x3dd   : > { %1602 = vxpose.xlu1.b32.start [1/2] (short) (narrow) %v1568_v7, 16  ;;  %1571 = vxpose.xlu0.b32.end [2/2] (short) (narrow) %v1565_v63, 16 }
 0x3e1   : > { %1603 = vxpose.xlu1.b32.end [2/2] (short) (narrow) %v1569_v6, 16  ;;  %1887 = vxpose.xlu0.b32.start [1/2] (short) (narrow) %v1885_v8, 16  ;;  %v3119_v6 = vpack.c.bf16 %v2288_v4, %v2287_v3  ;;  %v2370_v8 = vld [vmem:[#allocation16] sm:$0xff] }
 0x3e5   : > { %1922 = vxpose.xlu1.b32.start [1/2] (short) (narrow) %v2836_v9, 16  ;;  %1888 = vxpose.xlu0.b32.end [2/2] (short) (narrow) %v1886_v10, 16  ;;  %v2371_v9 = vld [vmem:[#allocation16 + $0x8] sm:$0xff] }
 0x3e6   : > { %v3123_v10 = vpack.c.bf16 %v2371_v9, %v2370_v8 }
 0x3e9   : > { %1923 = vxpose.xlu1.b32.end [2/2] (short) (narrow) %v2837_v11, 16  ;;  %v2455_v11 = vld [vmem:[#allocation17] sm:$0xff] }
 0x459   : > { %v1586_v12 = vpop.trf.xlu0 }
 0x45a   : > { %3000 = vmatprep.mubr.msk.f32.mxu1 %vm737_vm0, %v1586_v12 }
 0x45d   : > { %v1618_v13 = vpop.trf.xlu1  ;;  %v1587_v14 = vpop.trf.xlu0 }
 0x45e   : > { %v1796_v15 = vadd.f32 %v1618_v13, %v1586_v12  ;;  %3001 = vmatmul.mubr.msk.f32.vlgmr.msra.gmra.mrb[8].mxu1 %vm737_vm0, %v1587_v14  ;;  %3007 = vmatprep.mubr.msk.f32.mxu0 %vm737_vm0, %v1618_v13  ;;  %v2456_v12 = vld [vmem:[#allocation17 + $0x8] sm:$0xff] }
 0x45f   : > { %3106 = vmatpush3.bf16.msra.mxu1 %v4326_v35  ;;  %v3127_v13 = vpack.c.bf16 %v2456_v12, %v2455_v11 }
 0x460   : > { %3014 = vmatprep.mubr.msk.f32.mxu1 %vm737_vm0, %v1796_v15  ;;  %3112 = vmatprep.subr.bf16.mxu1 %v3111_v23 }
 0x461   : > { %v1619_v16 = vpop.trf.xlu1  ;;  %v1903_v27 = vpop.trf.xlu0 }
 0x462   : > { %v1797_v17 = vadd.f32 %v1619_v16, %v1587_v14  ;;  %3008 = vmatmul.mubr.msk.f32.vlgmr.msra.gmra.mrb[10].mxu0 %vm737_vm0, %v1619_v16  ;;  %v1954_v33 = vsub.f32 1.0, %v1903_v27 }
 0x463   : > { %3110 = vmatpush3.bf16.msra.mxu0 %v3107_v20 }
 0x464   : > { %3015 = vmatmul.mubr.msk.f32.vlgmr.msra.gmra.mrb[10].mxu1 %vm737_vm0, %v1797_v17  ;;  %3116 = vmatprep.subr.bf16.mxu0 %v3115_v26  ;;  %v1956_v40 = vmul.f32 %v1954_v33, %v1308_v53 }
 0x465   : > { %3114 = vmatpush3.bf16.msra.mxu1 %v3111_v23  ;;  %v1938_v28 = vpop.trf.xlu1  ;;  %v1904_v29 = vpop.trf.xlu0 }
 0x466   : > { %v1955_v31 = vsub.f32 1.0, %v1904_v29  ;;  %v1960_v41 = vsub.f32 1.0, %v1938_v28  ;;  %3120 = vmatprep.subr.bf16.mxu1 %v3119_v6 }
 0x468   : > { %v1957_v36 = vmul.f32 %v1955_v31, %v1309_v51  ;;  %v1962_v48 = vmul.f32 %v1960_v41, %v4368_v61 }
 0x469   : > { %v1939_v34 = vpop.trf.xlu1 }
 0x46a   : > { %v1961_v37 = vsub.f32 1.0, %v1939_v34 }
 0x46c   : > { %v1963_v55 = vmul.f32 %v1961_v37, %v4365_v59 }
 0x531   : > { %v3002_v30 = vpop.f32.mrb[8].mxu1 }
 0x532   : > { %v1706_v32 = vpop.f32.mrb[9].mxu1 }
 0x535   : > { %v3009_v35 = vpop.f32.mrb[10].mxu0 }
 0x536   : > { %v1880_v38 = vsub.f32 %v3002_v30, %v3009_v35  ;;  %v1787_v39 = vpop.f32.mrb[11].mxu0 }
 0x537   : > { %v1879_v42 = vsub.f32 %v1706_v32, %v1787_v39  ;;  %v3016_v43 = vpop.f32.mrb[10].mxu1 }
 0x538   : > { %v1959_v44 = vadd.f32 %v1957_v36, %v1880_v38  ;;  %v1882_v45 = vsub.f32 %v3016_v43, %v3002_v30  ;;  %v1870_v46 = vpop.f32.mrb[11].mxu1 }
 0x539   : > { %v1958_v47 = vadd.f32 %v1956_v40, %v1879_v42  ;;  %v1881_v54 = vsub.f32 %v1870_v46, %v1706_v32 }
 0x53a   : > { %v1884_v56 = vsub.f32 %v1882_v45, %v3009_v35 }
 0x53b   : > { %v1883_v50 = vsub.f32 %v1881_v54, %v1787_v39  ;;  %3021 = vmatprep.mubr.msk.f32.mxu0 %vm737_vm0, %v1958_v47 }
 0x53c   : > { %v1965_v51 = vadd.f32 %v1963_v55, %v1884_v56  ;;  %3022 = vmatmul.mubr.msk.f32.vlgmr.msra.gmra.mrb[12].mxu0 %vm737_vm0, %v1959_v44 }
 0x53d   : > { %v1964_v49 = vadd.f32 %v1962_v48, %v1883_v50  ;;  %3118 = vmatpush3.bf16.msra.mxu0 %v3115_v26 }
 0x53e   : > { %v2133_v52 = vadd.f32 %v1965_v51, %v1959_v44  ;;  %3124 = vmatprep.subr.bf16.mxu0 %v3123_v10 }
 0x53f   : > { %v2132_v53 = vadd.f32 %v1964_v49, %v1958_v47  ;;  %3028 = vmatprep.mubr.msk.f32.mxu1 %vm737_vm0, %v1964_v49 }
 0x540   : > { %3029 = vmatmul.mubr.msk.f32.vlgmr.msra.gmra.mrb[12].mxu1 %vm737_vm0, %v1965_v51 }
 0x541   : > { %3035 = vmatprep.mubr.msk.f32.mxu0 %vm737_vm0, %v2132_v53  ;;  %3122 = vmatpush3.bf16.msra.mxu1 %v3119_v6 }
 0x542   : > { %3036 = vmatmul.mubr.msk.f32.vlgmr.msra.gmra.mrb[14].mxu0 %vm737_vm0, %v2133_v52  ;;  %3128 = vmatprep.subr.bf16.mxu1 %v3127_v13 }
 0x543   : > { %3126 = vmatpush3.bf16.msra.mxu0 %v3123_v10 }
 0x60f   : > { %v3023_v57 = vpop.f32.mrb[12].mxu0 }
 0x610   : > { %v2040_v58 = vpop.f32.mrb[13].mxu0 }
 0x613   : > { %v3030_v59 = vpop.f32.mrb[12].mxu1 }
 0x614   : > { %v2218_v60 = vsub.f32 %v3023_v57, %v3030_v59  ;;  %v2123_v61 = vpop.f32.mrb[13].mxu1 }
 0x615   : > { %v3037_v62 = vpop.f32.mrb[14].mxu0  ;;  %v2217_v63 = vsub.f32 %v2040_v58, %v2123_v61 }
 0x616   : > { %v2220_v0 = vsub.f32 %v3037_v62, %v3023_v57  ;;  %v2208_v1 = vpop.f32.mrb[15].mxu0 }
 0x617   : > { %v2219_v2 = vsub.f32 %v2208_v1, %v2040_v58  ;;  %2223 = vxpose.xlu0.b32.start [1/2] (short) (narrow) %v2217_v63, 16 }
 0x618   : > { %v2222_v5 = vsub.f32 %v2220_v0, %v3030_v59 }
 0x619   : > { %v2221_v7 = vsub.f32 %v2219_v2, %v2123_v61 }
 0x61b   : > { %2255 = vxpose.xlu1.b32.start [1/2] (short) (narrow) %v2221_v7, 16  ;;  %2224 = vxpose.xlu0.b32.end [2/2] (short) (narrow) %v2218_v60, 16 }
 0x61f   : > { %2256 = vxpose.xlu1.b32.end [2/2] (short) (narrow) %v2222_v5, 16 }
 0x697   : > { %v2239_v14 = vpop.trf.xlu0 }
 0x698   : > { %3042 = vmatprep.mubr.msk.f32.mxu1 %vm737_vm0, %v2239_v14 }
 0x69b   : > { %v2271_v15 = vpop.trf.xlu1  ;;  %v2240_v16 = vpop.trf.xlu0 }
 0x69c   : > { %v2453_v17 = vadd.f32 %v2271_v15, %v2239_v14  ;;  %3043 = vmatmul.mubr.msk.f32.vlgmr.msra.gmra.mrb[14].mxu1 %vm737_vm0, %v2240_v16  ;;  %3049 = vmatprep.mubr.msk.f32.mxu0 %vm737_vm0, %v2271_v15 }
 0x69d   : > { %3130 = vmatpush3.bf16.msra.mxu1 %v3127_v13 }
 0x69e   : > { %3056 = vmatprep.mubr.msk.f32.mxu1 %vm737_vm0, %v2453_v17 }
 0x69f   : > { %v2272_v18 = vpop.trf.xlu1 }
 0x6a0   : > { %v2454_v19 = vadd.f32 %v2272_v18, %v2240_v16  ;;  %3050 = vmatmul.mubr.msk.f32.vlgmr.msra.gmra.mrb[16].mxu0 %vm737_vm0, %v2272_v18 }
 0x6a2   : > { %3057 = vmatmul.mubr.msk.f32.vlgmr.msra.gmra.mrb[16].mxu1 %vm737_vm0, %v2454_v19 }
 0x76f   : > { %v3044_v20 = vpop.f32.mrb[14].mxu1 }
 0x770   : > { %v2361_v21 = vpop.f32.mrb[15].mxu1 }
 0x773   : > { %v3051_v22 = vpop.f32.mrb[16].mxu0 }
 0x774   : > { %v2539_v23 = vsub.f32 %v3044_v20, %v3051_v22  ;;  %v2444_v24 = vpop.f32.mrb[17].mxu0 }
 0x775   : > { %v2538_v25 = vsub.f32 %v2361_v21, %v2444_v24  ;;  %v3058_v26 = vpop.f32.mrb[16].mxu1 }
 0x776   : > { %2545 = vst.msk [vmem:[%s729_s17 + $0x8] sm:$0xff] %vm737_vm0, %v2539_v23  ;;  %v2541_v27 = vsub.f32 %v3058_v26, %v3044_v20  ;;  %v2529_v28 = vpop.f32.mrb[17].mxu1 }
 0x777   : > { %2544 = vst.msk [vmem:[%s729_s17] sm:$0xff] %vm737_vm0, %v2538_v25  ;;  %v2540_v29 = vsub.f32 %v2529_v28, %v2361_v21 }
 0x778   : > { %v2543_v30 = vsub.f32 %v2541_v27, %v3051_v22 }
 0x779   : > { %v2542_v31 = vsub.f32 %v2540_v29, %v2444_v24 }
 0x77a   : > { %2851 = vst.msk [vmem:[%s729_s17 + $0x18] sm:$0xff] %vm737_vm0, %v2543_v30 }
 0x77b   : > { %2850 = vst.msk [vmem:[%s729_s17 + $0x10] sm:$0xff] %vm737_vm0, %v2542_v31 }
 0x77c   : > { %3676 = shalt.err (!%p3673_p1)
}
 0x77d   : > { %s3677_s30 = scalar_lea.hbm %s4416_s9, 512  ;;  %s3681_s0 = scalar_lea.hbm %s4586_s22, 1024 }
 0x77e   : > { %p3678_p5 = scmp.ne.s32.totalorder %s4416_s9, %s3677_s30  ;;  %p3682_p0 = scmp.lt.u32.totalorder %s4416_s9, %s4586_s22 }
 0x77f   : > { %p3683_p2 = scmp.lt.u32.totalorder %s3681_s0, %s3677_s30  ;;  %p3685_p12 = scmp.lt.u32.totalorder %s3677_s30, %s4416_s9 }
 0x780   : > { %p3679_p9 = pnand %p3678_p5, %p4587_p3 }
 0x781   : > { %p3684_p13 = por %p3683_p2, %p3682_p0 }
 0x782   : > { %p3680_p8 = pneg %p3679_p9 }
 0x783   : > { %p3686_p7 = por %p3685_p12, %p3684_p13 }
 0x785   : > { %p3687_p6 = pnand %p3686_p7, %p3680_p8 }
 0x787   : > { %3690 = shalt.err (!%p3687_p6)
}
 0x788   : > { %s3771_s27 = smov 128   ;;  %s3772_s17 = smov 8  }
 0x789   : > { %3177 = dma.vmem_to_hbm [thread:$0]  (%p4587_p3), %s4410_s5, 512, %s4416_s9, %s4422_s25, %s3771_s27, %s3771_s27, %s3772_s17  }
 0x78a PF: > { %s4588_s1 = sld [smem:[#allocation31_spill]]  ;;  %s4589_s14 = sld [smem:[#allocation41_spill]] }
 0x78b   : > { %s4590_s2 = sld [smem:[#allocation34_spill]] }
 0x790   : > { %s2578_s21 = sand.u32 1, %s4588_s1   ;;  %p4591_p10 = scmp.ne.s32.totalorder %s4589_s14, 0 }
 0x791   : > { %p4592_p11 = scmp.ge.s32.totalorder %s4590_s2, 2  ;;  %s2579_s16 = scalar_lea.sflag [#allocation4], %s2578_s21 }
 0x793   : > { %p3221_p4 = pnand %p4592_p11, %p4591_p10 }
 0x795   : > { %3736 = dma.done.wait (!%p3221_p4), %s2579_s16, 512  }
 0x796   : > { %3738 = vsyncadd (!%p3221_p4), %s2579_s16, 4294966784  ;;  %s4593_s21 = sld [smem:[#allocation37_spill]]  ;;  %s4594_s18 = sld [smem:[#allocation32_spill]] }
 0x797   : > { %s4595_s19 = sld [smem:[#allocation33_spill]]  ;;  %s4596_s20 = sld [smem:[#allocation38_spill]] }
 0x79c   : > { %p31_p1 = scmp.ge.s32.totalorder %s4593_s21, 4  }
 0x79e   :  { %33 = sbr.rel (!%p31_p1) target bundleno = 19 (0x13), region = 190 }
 0x7a5   :  { %2584 = vsyncpa [#allocation3], 1 }
 0x7a6   :  { %2586 = vsyncpa [#allocation3 + $0x1], 1 }
 0x7a7   :  { %2587 = vsyncpa [#allocation6], 1 }
 0x7a8   :  { %2588 = vsyncpa [#allocation9], 1 }
 0x7a9   :  { %2589 = vsyncpa [#allocation12], 1 }
 0x7aa   :  { %2590 = vsyncpa [#allocation15], 1 }
 0x7ab   :  { %2591 = vsyncpa [#allocation18], 1 }
 0x7ac   :  { %2592 = vsyncpa [#allocation4], 1 }
 0x7ad   :  { %2594 = vsyncpa [#allocation4 + $0x1], 1 }

</bundles_post_ra>
